<compile_context>
chip_gen: v6e
topology: v6e:2x2x1
jax: 0.10.0
libtpu: 0.0.40
codegen_flags: <defaults>
</compile_context>

<pallas_src>
import jax
import jax.numpy as jnp
from jax.experimental import pallas as pl
from jax.experimental.pallas import tpu as pltpu

C_IN = 3
C_PAD = 8          # pad input channels 3 -> 8
C1, C2, C3, C4 = 128, 256, 512, 1024


# --------------------------------------------------------------------------
# kernels
# --------------------------------------------------------------------------
def _make_feat_kernel(n_valid, tile_n, tiles_per_core, need_mask):
    """Pass A: pf = conv2(relu(conv1(x))); running max over points -> (8, 256)."""

    def update(out_ref, vals, lin, masked):
        if masked:
            rows = lin * tile_n + jax.lax.broadcasted_iota(jnp.int32, (tile_n, 1), 0)
            vals = jnp.where(rows < n_valid, vals, -jnp.inf)
        # fold tile rows into 8 sublanes with plain VPU maxima; defer the
        # cross-sublane reduce to the wrapper.
        folded = jnp.max(vals.reshape(tile_n // 8, 8, vals.shape[-1]), axis=0)
        out_ref[...] = jnp.maximum(out_ref[...], folded[None, None])

    def kernel(x_ref, w1_ref, b1_ref, w2_ref, b2_ref, feat_ref):
        c = pl.program_id(1)
        t = pl.program_id(2)

        @pl.when(t == 0)
        def _():
            feat_ref[...] = jnp.full_like(feat_ref, -jnp.inf)

        x = x_ref[0]                                             # (tile_n, 8) bf16
        h1 = jnp.maximum(
            jnp.dot(x, w1_ref[...], preferred_element_type=jnp.float32)
            + b1_ref[...], 0.0)                                  # (tile_n, 128) f32
        pf = jnp.dot(h1.astype(jnp.bfloat16), w2_ref[...],
                     preferred_element_type=jnp.float32) + b2_ref[...]   # (tile_n, 256)

        if need_mask:
            lin = c * tiles_per_core + t
            has_pad = (lin + 1) * tile_n > n_valid

            @pl.when(jnp.logical_not(has_pad))
            def _():
                update(feat_ref, pf, lin, False)

            @pl.when(has_pad)
            def _():
                update(feat_ref, pf, lin, True)
        else:
            update(feat_ref, pf, 0, False)

    return kernel


def _make_out_kernel(n_valid, tile_n, tiles_per_core, need_mask):
    """Pass B: recompute pf, conv3/conv4; running max over points -> (8, 1024)."""

    def update(out_ref, vals, lin, masked):
        if masked:
            rows = lin * tile_n + jax.lax.broadcasted_iota(jnp.int32, (tile_n, 1), 0)
            vals = jnp.where(rows < n_valid, vals, -jnp.inf)
        folded = jnp.max(vals.reshape(tile_n // 8, 8, vals.shape[-1]), axis=0)
        out_ref[...] = jnp.maximum(out_ref[...], folded[None, None])

    def kernel(x_ref, feat_ref, w1_ref, b1_ref, w2_ref, b2_ref,
               w3a_ref, w3b_ref, b3_ref, w4_ref, b4_ref,
               out_ref, b3eff_ref):
        c = pl.program_id(1)
        t = pl.program_id(2)

        @pl.when(t == 0)
        def _():
            # hoist the global-feature half of conv3: b3_eff = b3 + feat @ W3b
            b3eff_ref[...] = b3_ref[...] + jnp.dot(
                feat_ref[0].astype(jnp.bfloat16), w3b_ref[...],
                preferred_element_type=jnp.float32)
            out_ref[...] = jnp.full_like(out_ref, -jnp.inf)

        x = x_ref[0]                                             # (tile_n, 8) bf16
        h1 = jnp.maximum(
            jnp.dot(x, w1_ref[...], preferred_element_type=jnp.float32)
            + b1_ref[...], 0.0)                                  # (tile_n, 128)
        pf = jnp.dot(h1.astype(jnp.bfloat16), w2_ref[...],
                     preferred_element_type=jnp.float32) + b2_ref[...]   # (tile_n, 256)
        h3 = jnp.maximum(
            jnp.dot(pf.astype(jnp.bfloat16), w3a_ref[...],
                    preferred_element_type=jnp.float32) + b3eff_ref[...], 0.0)
        h4 = jnp.dot(h3.astype(jnp.bfloat16), w4_ref[...],
                     preferred_element_type=jnp.float32) + b4_ref[...]   # (tile_n, 1024)

        if need_mask:
            lin = c * tiles_per_core + t
            has_pad = (lin + 1) * tile_n > n_valid

            @pl.when(jnp.logical_not(has_pad))
            def _():
                update(out_ref, h4, lin, False)

            @pl.when(has_pad)
            def _():
                update(out_ref, h4, lin, True)
        else:
            update(out_ref, h4, 0, False)

    return kernel


# --------------------------------------------------------------------------
# wrapper helpers
# --------------------------------------------------------------------------
def _default_core_splits():
    """NC=2 only on v7x (2 TensorCores/chip); 1 elsewhere (v5e/v6e)."""
    try:
        kind = jax.devices()[0].device_kind.lower()
    except Exception:
        return 1
    return 2 if ("v7" in kind or "tpu7" in kind) else 1


def _const_spec(shape):
    """BlockSpec for grid-invariant weights/biases; single-buffered when supported."""
    nd = len(shape)
    idx = lambda b, c, t, _nd=nd: (0,) * _nd
    try:
        return pl.BlockSpec(shape, idx, pipeline_mode=pl.Buffered(1))
    except (TypeError, AttributeError):
        return pl.BlockSpec(shape, idx)


def _vmem_budget_a(tile_a):
    bf16, f32 = 2, 4
    w = bf16 * (C_PAD * C1 + C1 * C2) + f32 * (C1 + C2)
    x = bf16 * tile_a * C_PAD * 2                         # double-buffered input tile
    act = tile_a * ((C1 + C2) * f32 + (C1 + C2) * bf16)   # f32 temps + bf16 casts
    out = 8 * C2 * f32 * 2
    return min(w + x + 2 * act + out + (8 << 20), 48 << 20)


def _vmem_budget_b(tile_b):
    bf16, f32 = 2, 4
    w = bf16 * (C_PAD * C1 + C1 * C2 + 2 * C2 * C3 + C3 * C4) + f32 * (C1 + C2 + C3 + C4)
    x = bf16 * tile_b * C_PAD * 2
    act = tile_b * ((C1 + C2 + C3 + C4) * f32 + (C1 + C2 + C3) * bf16)
    out = 8 * C4 * f32 * 2
    return min(w + x + 2 * act + out + (8 << 20), 48 << 20)


def _round128(v):
    return 128 * max(1, -(-int(v) // 128))


# --------------------------------------------------------------------------
# wrapper
# --------------------------------------------------------------------------
def pcn_encoder(x_bcn, params, *, tile_n=None, n_core_splits=None):
    """x_bcn: (B, 3, N) float32 (PyTorch Conv1d layout). Returns (B, 1024) float32."""
    B, C, N = x_bcn.shape
    assert C == C_IN
    NC = _default_core_splits() if n_core_splits is None else max(1, int(n_core_splits))

    # pass-B tile (full conv stack): default 1024 rows; pass-A tile (conv1/2 only,
    # overhead-bound): up to 4x larger, and a multiple of tile_b so one padding works.
    if tile_n is None:
        tile_b = min(1024, _round128(-(-N // NC)))
    else:
        tile_b = _round128(tile_n)
    mult = max(1, min(4, 4096 // tile_b, -(-N // (NC * tile_b))))
    tile_a = mult * tile_b
    tiles_a = -(-N // (NC * tile_a))          # pass-A tiles per core split
    tiles_b = tiles_a * mult                  # pass-B tiles per core split
    n_pad = NC * tiles_a * tile_a
    need_mask = (n_pad != N)

    (w1, b1, w2, b2, w3a, w3b, b3, w4, b4) = params

    # (B, N, C) layout, bf16, zero-padded points and channels
    x = jnp.transpose(x_bcn, (0, 2, 1)).astype(jnp.bfloat16)
    x = jnp.pad(x, ((0, 0), (0, n_pad - N), (0, C_PAD - C)))      # (B, n_pad, 8)

    def x_spec(tile, tiles_per_core):
        return pl.BlockSpec(
            (1, tile, C_PAD),
            lambda b, c, t, _tpc=tiles_per_core: (b, c * _tpc + t, 0))

    def acc_out_spec(cdim):
        return pl.BlockSpec((1, 1, 8, cdim), lambda b, c, t: (b, c, 0, 0))

    sem = ("parallel", "parallel", "arbitrary")
    cp_a = pltpu.CompilerParams(dimension_semantics=sem,
                                vmem_limit_bytes=_vmem_budget_a(tile_a))
    cp_b = pltpu.CompilerParams(dimension_semantics=sem,
                                vmem_limit_bytes=_vmem_budget_b(tile_b))

    bytes_x = B * n_pad * C_PAD * 2
    ce_a = pl.CostEstimate(
        flops=2 * B * n_pad * (C_PAD * C1 + C1 * C2),
        transcendentals=0,
        bytes_accessed=bytes_x + 2 * (C_PAD * C1 + C1 * C2) + 4 * (C1 + C2)
        + B * NC * 8 * C2 * 4)
    ce_b = pl.CostEstimate(
        flops=2 * B * n_pad * (C_PAD * C1 + C1 * C2 + C2 * C3 + C3 * C4)
        + 2 * B * NC * C2 * C3,
        transcendentals=0,
        bytes_accessed=bytes_x + B * C2 * 4
        + 2 * (C_PAD * C1 + C1 * C2 + 2 * C2 * C3 + C3 * C4)
        + 4 * (C1 + C2 + C3 + C4) + B * NC * 8 * C4 * 4)

    # ---- pass A: feat = max_N(conv2(relu(conv1(x)))) ----
    feat_partial = pl.pallas_call(
        _make_feat_kernel(N, tile_a, tiles_a, need_mask),
        out_shape=jax.ShapeDtypeStruct((B, NC, 8, C2), jnp.float32),
        grid_spec=pltpu.PrefetchScalarGridSpec(
            num_scalar_prefetch=0,
            grid=(B, NC, tiles_a),
            in_specs=[x_spec(tile_a, tiles_a),
                      _const_spec(w1.shape), _const_spec(b1.shape),
                      _const_spec(w2.shape), _const_spec(b2.shape)],
            out_specs=acc_out_spec(C2),
        ),
        compiler_params=cp_a,
        cost_estimate=ce_a,
    )(x, w1, b1, w2, b2)
    feat = jnp.max(feat_partial, axis=(1, 2))                      # (B, 256) f32

    # ---- pass B: out = max_N(conv4(relu(conv3([pf, feat])))) ----
    feat3 = feat.reshape(B, 1, C2)
    feat_spec = pl.BlockSpec((1, 1, C2), lambda b, c, t: (b, 0, 0))
    out_partial = pl.pallas_call(
        _make_out_kernel(N, tile_b, tiles_b, need_mask),
        out_shape=jax.ShapeDtypeStruct((B, NC, 8, C4), jnp.float32),
        grid_spec=pltpu.PrefetchScalarGridSpec(
            num_scalar_prefetch=0,
            grid=(B, NC, tiles_b),
            in_specs=[x_spec(tile_b, tiles_b), feat_spec,
                      _const_spec(w1.shape), _const_spec(b1.shape),
                      _const_spec(w2.shape), _const_spec(b2.shape),
                      _const_spec(w3a.shape), _const_spec(w3b.shape),
                      _const_spec(b3.shape),
                      _const_spec(w4.shape), _const_spec(b4.shape)],
            out_specs=acc_out_spec(C4),
            scratch_shapes=[pltpu.VMEM((1, C3), jnp.float32)],
        ),
        compiler_params=cp_b,
        cost_estimate=ce_b,
    )(x, feat3, w1, b1, w2, b2, w3a, w3b, b3, w4, b4)

    return jnp.max(out_partial, axis=(1, 2))                       # (B, 1024)


# --------------------------------------------------------------------------
# params / reference
# --------------------------------------------------------------------------
def init_params(key):
    """Deterministic synthetic weights with PyTorch Conv1d init; returns
    (kernel-ready bf16/split params, raw f32 params for the reference)."""
    ks = jax.random.split(key, 8)

    def u(k, shape, fan_in):
        bound = 1.0 / jnp.sqrt(fan_in)
        return jax.random.uniform(k, shape, jnp.float32, -bound, bound)

    w1 = u(ks[0], (C_IN, C1), C_IN)          # conv1: 3 -> 128  (stored (in, out))
    b1 = u(ks[1], (1, C1), C_IN)
    w2 = u(ks[2], (C1, C2), C1)              # conv2: 128 -> 256
    b2 = u(ks[3], (1, C2), C1)
    w3 = u(ks[4], (C3, C3), C3)              # conv3: 512 -> 512
    b3 = u(ks[5], (1, C3), C3)
    w4 = u(ks[6], (C3, C4), C3)              # conv4: 512 -> 1024
    b4 = u(ks[7], (1, C4), C3)

    w1_pad = jnp.zeros((C_PAD, C1), jnp.float32).at[:C_IN].set(w1)
    # NOTE: weights quantized to bf16 once (MXU-friendly); f32 accumulation in-kernel.
    kparams = (w1_pad.astype(jnp.bfloat16), b1,
               w2.astype(jnp.bfloat16), b2,
               w3[:C2].astype(jnp.bfloat16),       # pointfeat half of W3
               w3[C2:].astype(jnp.bfloat16),       # global-feat half of W3
               b3,
               w4.astype(jnp.bfloat16), b4)
    raw = (w1, b1, w2, b2, w3, b3, w4, b4)
    return kparams, raw


def reference(x_bcn, raw_params):
    """Pure-JAX f32 reference mirroring the PyTorch forward."""
    w1, b1, w2, b2, w3, b3, w4, b4 = raw_params
    x = jnp.transpose(x_bcn, (0, 2, 1))                    # (B, N, 3)
    h1 = jax.nn.relu(x @ w1 + b1)                          # (B, N, 128)
    pf = h1 @ w2 + b2                                      # (B, N, 256)
    feat = jnp.max(pf, axis=1, keepdims=True)              # (B, 1, 256)
    cat = jnp.concatenate([pf, jnp.broadcast_to(feat, pf.shape)], axis=-1)
    h3 = jax.nn.relu(cat @ w3 + b3)                        # (B, N, 512)
    h4 = h3 @ w4 + b4                                      # (B, N, 1024)
    return jnp.max(h4, axis=1)                             # (B, 1024)


if __name__ == "__main__":
    key = jax.random.PRNGKey(0)
    k_params, k_x = jax.random.split(key)

    # Small shapes; N deliberately not a multiple of the tile so the masked tail tile,
    # a fully-padded tile, the multi-tile running max, and the core split are all hit.
    B, N = 2, 300
    params, raw_params = init_params(k_params)
    x = jax.random.normal(k_x, (B, C_IN, N), jnp.float32)   # PyTorch layout (B, C, N)

    ref = reference(x, raw_params)

    out = pcn_encoder(x, params, tile_n=128, n_core_splits=2)
    out = jax.block_until_ready(out)
    assert out.shape == (B, C4), out.shape
    # bf16 matmuls (f32 accumulation) -> loosened tolerance vs f32 reference
    assert jnp.allclose(out, ref, atol=5e-2, rtol=5e-2), \
        float(jnp.max(jnp.abs(out - ref)))

    # default configuration (auto tile sizes / auto core split) sanity check
    out2 = jax.block_until_ready(pcn_encoder(x, params))
    assert out2.shape == (B, C4), out2.shape
    assert jnp.allclose(out2, ref, atol=5e-2, rtol=5e-2), \
        float(jnp.max(jnp.abs(out2 - ref)))

    print("KERNEL_OK")
</pallas_src>

<mosaic_0001>
module attributes {stable_mosaic.version = 11 : i64} {
  func.func @kernel(%arg0: i32, %arg1: i32, %arg2: i32, %arg3: memref<1x256x8xbf16, #tpu.memory_space<vmem>>, %arg4: memref<8x128xbf16, #tpu.memory_space<vmem>>, %arg5: memref<1x128xf32, #tpu.memory_space<vmem>>, %arg6: memref<128x256xbf16, #tpu.memory_space<vmem>>, %arg7: memref<1x256xf32, #tpu.memory_space<vmem>>, %arg8: memref<1x1x8x256xf32, #tpu.memory_space<vmem>>) attributes {dimension_semantics = [#tpu.dimension_semantics<parallel>, #tpu.dimension_semantics<parallel>, #tpu.dimension_semantics<arbitrary>], iteration_bounds = array<i64: 2, 2, 1>, scalar_prefetch = 0 : i64, scratch_operands = 0 : i64, tpu.core_type = #tpu.core_type<tc>, window_params = [{transform_indices = @transform_0, window_bounds = array<i64: 1, 256, 8>}, {pipeline_mode = #tpu.pipeline_mode<synchronous>, transform_indices = @transform_1, window_bounds = array<i64: 8, 128>}, {pipeline_mode = #tpu.pipeline_mode<synchronous>, transform_indices = @transform_2, window_bounds = array<i64: 1, 128>}, {pipeline_mode = #tpu.pipeline_mode<synchronous>, transform_indices = @transform_3, window_bounds = array<i64: 128, 256>}, {pipeline_mode = #tpu.pipeline_mode<synchronous>, transform_indices = @transform_4, window_bounds = array<i64: 1, 256>}, {transform_indices = @transform_5, window_bounds = array<i64: 1, 1, 8, 256>}]} {
    %c0_i32 = arith.constant 0 : i32
    %0 = arith.cmpi eq, %arg2, %c0_i32 : i32
    %1 = arith.extui %0 : i1 to i32
    %c0_i32_0 = arith.constant 0 : i32
    %2 = arith.cmpi ne, %1, %c0_i32_0 : i32
    scf.if %2 {
      %cst_16 = arith.constant 0xFF800000 : f32
      %28 = vector.broadcast %cst_16 : f32 to vector<1x1x8x256xf32>
      %c0_17 = arith.constant 0 : index
      %c0_18 = arith.constant 0 : index
      %c0_19 = arith.constant 0 : index
      %c0_20 = arith.constant 0 : index
      %29 = vector.load %arg8[%c0_17, %c0_18, %c0_19, %c0_20] : memref<1x1x8x256xf32, #tpu.memory_space<vmem>>, vector<1x1x8x256xf32>
      tpu.vector_store %arg8[%c0_17, %c0_18, %c0_19, %c0_20], %28 {strides = array<i32>} : memref<1x1x8x256xf32, #tpu.memory_space<vmem>>, vector<1x1x8x256xf32>,
    } else {
    }
    %c0 = arith.constant 0 : index
    %c0_1 = arith.constant 0 : index
    %c0_2 = arith.constant 0 : index
    %3 = vector.load %arg3[%c0, %c0_1, %c0_2] : memref<1x256x8xbf16, #tpu.memory_space<vmem>>, vector<1x256x8xbf16>
    %4 = vector.shape_cast %3 : vector<1x256x8xbf16> to vector<256x8xbf16>
    %c0_3 = arith.constant 0 : index
    %c0_4 = arith.constant 0 : index
    %5 = vector.load %arg4[%c0_3, %c0_4] : memref<8x128xbf16, #tpu.memory_space<vmem>>, vector<8x128xbf16>
    %cst = arith.constant dense<0.000000e+00> : vector<256x128xf32>
    %6 = tpu.matmul %4, %5, %cst {dimension_numbers = #tpu.dot_dimension_numbers<[1], [0], [0], [1], [0, 0, 1, 1], [], []>} : vector<256x8xbf16>, vector<8x128xbf16>, vector<256x128xf32> -> vector<256x128xf32>
    %c0_5 = arith.constant 0 : index
    %c0_6 = arith.constant 0 : index
    %7 = vector.load %arg5[%c0_5, %c0_6] : memref<1x128xf32, #tpu.memory_space<vmem>>, vector<1x128xf32>
    %8 = vector.broadcast %7 : vector<1x128xf32> to vector<256x128xf32>
    %9 = arith.addf %6, %8 : vector<256x128xf32>
    %cst_7 = arith.constant 0.000000e+00 : f32
    %10 = vector.broadcast %cst_7 : f32 to vector<256x128xf32>
    %11 = arith.maximumf %9, %10 : vector<256x128xf32>
    %12 = arith.truncf %11 : vector<256x128xf32> to vector<256x128xbf16>
    %c0_8 = arith.constant 0 : index
    %c0_9 = arith.constant 0 : index
    %13 = vector.load %arg6[%c0_8, %c0_9] : memref<128x256xbf16, #tpu.memory_space<vmem>>, vector<128x256xbf16>
    %cst_10 = arith.constant dense<0.000000e+00> : vector<256x256xf32>
    %14 = tpu.matmul %12, %13, %cst_10 {dimension_numbers = #tpu.dot_dimension_numbers<[1], [0], [0], [1], [0, 0, 1, 1], [], []>} : vector<256x128xbf16>, vector<128x256xbf16>, vector<256x256xf32> -> vector<256x256xf32>
    %c0_11 = arith.constant 0 : index
    %c0_12 = arith.constant 0 : index
    %15 = vector.load %arg7[%c0_11, %c0_12] : memref<1x256xf32, #tpu.memory_space<vmem>>, vector<1x256xf32>
    %16 = vector.broadcast %15 : vector<1x256xf32> to vector<256x256xf32>
    %17 = arith.addf %14, %16 : vector<256x256xf32>
    %c1_i32 = arith.constant 1 : i32
    %18 = arith.muli %arg1, %c1_i32 : i32
    %19 = arith.addi %18, %arg2 : i32
    %c1_i32_13 = arith.constant 1 : i32
    %20 = arith.addi %19, %c1_i32_13 : i32
    %c256_i32 = arith.constant 256 : i32
    %21 = arith.muli %20, %c256_i32 : i32
    %c300_i32 = arith.constant 300 : i32
    %22 = arith.cmpi sgt, %21, %c300_i32 : i32
    %true = arith.constant true
    %23 = arith.xori %22, %true : i1
    %24 = arith.extui %23 : i1 to i32
    %c0_i32_14 = arith.constant 0 : i32
    %25 = arith.cmpi ne, %24, %c0_i32_14 : i32
    scf.if %25 {
      %28 = vector.shape_cast %17 : vector<256x256xf32> to vector<32x8x256xf32>
      %cst_16 = arith.constant dense<0xFF800000> : vector<8x256xf32>
      %29 = vector.multi_reduction <maximumf>, %28, %cst_16 [0] : vector<32x8x256xf32> to vector<8x256xf32>
      %c0_17 = arith.constant 0 : index
      %c0_18 = arith.constant 0 : index
      %c0_19 = arith.constant 0 : index
      %c0_20 = arith.constant 0 : index
      %30 = vector.load %arg8[%c0_17, %c0_18, %c0_19, %c0_20] : memref<1x1x8x256xf32, #tpu.memory_space<vmem>>, vector<1x1x8x256xf32>
      %31 = vector.shape_cast %29 : vector<8x256xf32> to vector<1x1x8x256xf32>
      %32 = arith.maximumf %30, %31 : vector<1x1x8x256xf32>
      %c0_21 = arith.constant 0 : index
      %c0_22 = arith.constant 0 : index
      %c0_23 = arith.constant 0 : index
      %c0_24 = arith.constant 0 : index
      %33 = vector.load %arg8[%c0_21, %c0_22, %c0_23, %c0_24] : memref<1x1x8x256xf32, #tpu.memory_space<vmem>>, vector<1x1x8x256xf32>
      tpu.vector_store %arg8[%c0_21, %c0_22, %c0_23, %c0_24], %32 {strides = array<i32>} : memref<1x1x8x256xf32, #tpu.memory_space<vmem>>, vector<1x1x8x256xf32>,
    } else {
    }
    %26 = arith.extui %22 : i1 to i32
    %c0_i32_15 = arith.constant 0 : i32
    %27 = arith.cmpi ne, %26, %c0_i32_15 : i32
    scf.if %27 {
      %c256_i32_16 = arith.constant 256 : i32
      %28 = arith.muli %19, %c256_i32_16 : i32
      %29 = tpu.iota {dimensions = array<i32: 0>} : vector<256x1xi32>
      %30 = vector.broadcast %28 : i32 to vector<256x1xi32>
      %31 = arith.addi %30, %29 : vector<256x1xi32>
      %c300_i32_17 = arith.constant 300 : i32
      %32 = vector.broadcast %c300_i32_17 : i32 to vector<256x1xi32>
      %33 = arith.cmpi slt, %31, %32 : vector<256x1xi32>
      %cst_18 = arith.constant 0xFF800000 : f32
      %34 = vector.shape_cast %33 : vector<256x1xi1> to vector<256x1xi1>
      %35 = vector.broadcast %34 : vector<256x1xi1> to vector<256x256xi1>
      %36 = vector.broadcast %cst_18 : f32 to vector<256x256xf32>
      %37 = arith.select %35, %17, %36 : vector<256x256xi1>, vector<256x256xf32>
      %38 = vector.shape_cast %37 : vector<256x256xf32> to vector<32x8x256xf32>
      %cst_19 = arith.constant dense<0xFF800000> : vector<8x256xf32>
      %39 = vector.multi_reduction <maximumf>, %38, %cst_19 [0] : vector<32x8x256xf32> to vector<8x256xf32>
      %c0_20 = arith.constant 0 : index
      %c0_21 = arith.constant 0 : index
      %c0_22 = arith.constant 0 : index
      %c0_23 = arith.constant 0 : index
      %40 = vector.load %arg8[%c0_20, %c0_21, %c0_22, %c0_23] : memref<1x1x8x256xf32, #tpu.memory_space<vmem>>, vector<1x1x8x256xf32>
      %41 = vector.shape_cast %39 : vector<8x256xf32> to vector<1x1x8x256xf32>
      %42 = arith.maximumf %40, %41 : vector<1x1x8x256xf32>
      %c0_24 = arith.constant 0 : index
      %c0_25 = arith.constant 0 : index
      %c0_26 = arith.constant 0 : index
      %c0_27 = arith.constant 0 : index
      %43 = vector.load %arg8[%c0_24, %c0_25, %c0_26, %c0_27] : memref<1x1x8x256xf32, #tpu.memory_space<vmem>>, vector<1x1x8x256xf32>
      tpu.vector_store %arg8[%c0_24, %c0_25, %c0_26, %c0_27], %42 {strides = array<i32>} : memref<1x1x8x256xf32, #tpu.memory_space<vmem>>, vector<1x1x8x256xf32>,
    } else {
    }
    return
  }
  func.func @transform_0(%arg0: i32, %arg1: i32, %arg2: i32) -> (i32, i32, i32) {
    %c1_i32 = arith.constant 1 : i32
    %0 = arith.muli %arg1, %c1_i32 : i32
    %1 = arith.addi %0, %arg2 : i32
    %c0_i32 = arith.constant 0 : i32
    %c0_i32_0 = arith.constant 0 : i32
    return %arg0, %1, %c0_i32 : i32, i32, i32
  }
  func.func @transform_1(%arg0: i32, %arg1: i32, %arg2: i32) -> (i32, i32) {
    %c0_i32 = arith.constant 0 : i32
    %c0_i32_0 = arith.constant 0 : i32
    %c0_i32_1 = arith.constant 0 : i32
    return %c0_i32, %c0_i32_0 : i32, i32
  }
  func.func @transform_2(%arg0: i32, %arg1: i32, %arg2: i32) -> (i32, i32) {
    %c0_i32 = arith.constant 0 : i32
    %c0_i32_0 = arith.constant 0 : i32
    %c0_i32_1 = arith.constant 0 : i32
    return %c0_i32, %c0_i32_0 : i32, i32
  }
  func.func @transform_3(%arg0: i32, %arg1: i32, %arg2: i32) -> (i32, i32) {
    %c0_i32 = arith.constant 0 : i32
    %c0_i32_0 = arith.constant 0 : i32
    %c0_i32_1 = arith.constant 0 : i32
    return %c0_i32, %c0_i32_0 : i32, i32
  }
  func.func @transform_4(%arg0: i32, %arg1: i32, %arg2: i32) -> (i32, i32) {
    %c0_i32 = arith.constant 0 : i32
    %c0_i32_0 = arith.constant 0 : i32
    %c0_i32_1 = arith.constant 0 : i32
    return %c0_i32, %c0_i32_0 : i32, i32
  }
  func.func @transform_5(%arg0: i32, %arg1: i32, %arg2: i32) -> (i32, i32, i32, i32) {
    %c0_i32 = arith.constant 0 : i32
    %c0_i32_0 = arith.constant 0 : i32
    %c0_i32_1 = arith.constant 0 : i32
    return %arg0, %arg1, %c0_i32, %c0_i32_0 : i32, i32, i32, i32
  }
}

</mosaic_0001>

<bundles_post_ra>
// kernel: tpu_custom_call.1
= control target key start
LH: loop header
LB: loop body
LE: loop exit
PB: predicated region body
PF: predicated region fallthrough
CT: control target
= control target key end

     0   :  { %s2722_s0 = inlined_call_operand.vmem [shape: bf16[2,512,8], index: 0, kind: input, shape index: {}]   ;;  %s2723_s1 = inlined_call_operand.vmem [shape: bf16[8,128], index: 1, kind: input, shape index: {}]   ;;  %s2724_s2 = inlined_call_operand.vmem [shape: f32[1,128], index: 2, kind: input, shape index: {}]   ;;  %s2725_s3 = inlined_call_operand.vmem [shape: bf16[128,256], index: 3, kind: input, shape index: {}]   ;;  %s2726_s4 = inlined_call_operand.vmem [shape: f32[1,256], index: 4, kind: input, shape index: {}]   ;;  %s2727_s5 = inlined_call_operand.hbm [shape: f32[2,2,8,256], index: 5, kind: output, shape index: {}]  }
   0x1   :  { %2760 = sst [smem:[#allocation44_spill]] %s2723_s1 }
   0x2   :  { %10 = vsyncpa [#allocation3], 0 }
   0x3   :  { %12 = vsyncpa [#allocation3 + $0x1], 0  ;;  %s1808_s18 = smov 0   ;;  %s1810_s19 = smov 0  }
   0x4   :  { %s1812_s20 = smov 0   ;;  %s1814_s21 = smov 0  }
   0x5   :  { %s1816_s22 = smov 0   ;;  %s1818_s23 = smov 0  }
   0x6   :  { %s1820_s24 = smov 0   ;;  %s1822_s25 = smov 0  }
   0x7 LB: > { %s1430_s26 = sadd.s32 4294967295, %s1773_s25   ;;  %s1431_s27 = sadd.s32 4294967294, %s1773_s25   ;;  %s1773_s25 = sphi %s1822_s25, %s18_s25   ;;  %s1769_s24 = sphi %s1820_s24, %s2859_s24   ;;  %s1765_s23 = sphi %s1818_s23, %s2858_s23   ;;  %s1761_s22 = sphi %s1816_s22, %s2857_s22   ;;  %s1757_s21 = sphi %s1814_s21, %s2856_s21   ;;  %s1753_s20 = sphi %s1812_s20, %s2855_s20   ;;  %s1749_s19 = sphi %s1810_s19, %s2854_s19   ;;  %s1745_s18 = sphi %s1808_s18, %s2853_s18  }
   0x8   : > { %s33_s28 = sadd.s32 1, %s1765_s23  ;;  %s37_s29 = sadd.s32 1, %s1769_s24 }
   0x9   : > { %p35_p0 = scmp.ge.s32.totalorder %s33_s28, 2  ;;  %p170_p1 = scmp.ne.s32.totalorder %s1753_s20, %s1749_s19 }
   0xa   : > { %p171_p2 = scmp.eq.s32.totalorder %s1430_s26, 3  ;;  %p176_p5 = scmp.ne.s32.totalorder %s1749_s19, %s1745_s18 }
   0xb   : > { %s2861_s28 = smov (%p35_p0, %s33_s28), 0  ;;  %s2863_s29 = smov (!%p35_p0, %s37_s29), %s1769_s24 }
   0xc   : > { %s156_s30 = ssub.s32 %s1765_s23, %s2861_s28  ;;  %p1859_p3 = por %p171_p2, %p170_p1 }
   0xd   : > { %p39_p4 = scmp.ge.s32.totalorder %s2863_s29, 2  ;;  %p177_p6 = scmp.eq.s32.totalorder %s1431_s27, 3 }
   0xe   : > { %p1434_p7 = scmp.ge.s32.totalorder %s1773_s25, 1  ;;  %p222_p9 = scmp.lt.s32.totalorder %s1773_s25, 5 }
   0xf   : > { %s2865_s29 = smov (%p39_p4, %s2863_s29), 0  ;;  %p1868_p8 = por %p177_p6, %p176_p5 }
  0x10   : > { %2762 = sst [smem:[#allocation5_spill]] %s2865_s29  ;;  %s155_s8 = ssub.s32 %s1769_s24, %s2865_s29 }
  0x11   : > { %s160_s9 = sadd.s32 1, %s1753_s20  ;;  %s157_s10 = sor.u32 %s156_s30, %s155_s8 }
  0x12   : > { %p223_p10 = pnand %p1434_p7, %p222_p9  ;;  %p158_p11 = scmp.eq.s32.totalorder %s157_s10, 0 }
  0x14   : > { %s1877_s11 = scalar_select %p158_p11, %s1753_s20, %s160_s9  }
  0x15   : > { %226 = sbr.rel (%p223_p10) target bundleno = 679 (0x2a7), region = 40 }
  0x1a   : > { %s2728_s12 = sand.u32 1, %s1749_s19   ;;  %s2764_s1 = sld [smem:[#allocation44_spill]]  ;;  %vm443_vm0 = vcmask 1043456   ;;  %v1659_v2 = vld [vmem:[%s2725_s3 + $0x74] ss:$8 sps:$4 sm:$0xff]   ;;  %v1775_v3 = vmov -inf  }
  0x1b   : > { %s1436_s15 = sshll.u32 %s1757_s21, 5  ;;  %s1435_s16 = sshll.u32 %s2728_s12, 4  ;;  %v1657_v4 = vld [vmem:[%s2725_s3 + $0x70] ss:$8 sps:$4 sm:$0xff]   ;;  %v1662_v5 = vld [vmem:[%s2725_s3 + $0x64] ss:$8 sps:$4 sm:$0xff]   ;;  %1551 = vmatprep.subr.bf16.mxu1 %v1659_v2 }
  0x1c   : > { %p257_p12 = scmp.lt.s32.totalorder %s1761_s22, 1  ;;  %p259_p13 = scmp.lt.s32.totalorder %s1436_s15, 63  ;;  %1559 = vmatpush1.bf16.msra.mxu1 %v1657_v4  ;;  %v1660_v6 = vld [vmem:[%s2725_s3 + $0x60] ss:$8 sps:$4 sm:$0xff]   ;;  %vm394_vm1 = vcmask 64512   ;;  %v1776_v35 = vmov 0  }
  0x1d   : > { %s1890_s27 = scalar_lea.vmem [#allocation2], %s1435_s16  ;;  %1552 = vmatprep.subr.bf16.mxu1 %v1662_v5  ;;  %v1665_v7 = vld [vmem:[%s2725_s3 + $0x54] ss:$8 sps:$4 sm:$0xff]   ;;  %v1663_v11 = vld [vmem:[%s2725_s3 + $0x50] ss:$8 sps:$4 sm:$0xff]   ;;  %846 = vmatprep.mubr.bf16.mxu1 %v1776_v35  ;;  %s1498_s10 = sshll.u32 %s1757_s21, 8 }
  0x1e   : > { %272 = vst [vmem:[%s1890_s27] sm:$0xff] %v1775_v3  ;;  %273 = vst [vmem:[%s1890_s27 + $0x8] sm:$0xff] %v1775_v3  ;;  %s258_s30 = scalar_select %p257_p12, %s1761_s22, 1  ;;  %v1668_v12 = vld [vmem:[%s2725_s3 + $0x44] ss:$8 sps:$4 sm:$0xff]   ;;  %v1666_v13 = vld [vmem:[%s2725_s3 + $0x40] ss:$8 sps:$4 sm:$0xff]  }
  0x1f   : > { %s2867_s15 = smov (!%p259_p13, %s1436_s15), 63  ;;  %v1671_v14 = vld [vmem:[%s2725_s3 + $0x34] ss:$8 sps:$4 sm:$0xff]   ;;  %v1669_v17 = vld [vmem:[%s2725_s3 + $0x30] ss:$8 sps:$4 sm:$0xff]  }
  0x20   : > { %v306_v0 = vld [vmem:[%s2764_s1] sm:$0xf]  ;;  %s1437_s14 = sshll.u32 %s258_s30, 6  ;;  %1560 = vmatpush1.bf16.msra.mxu1 %v1660_v6  ;;  %v1674_v29 = vld [vmem:[%s2725_s3 + $0x24] ss:$8 sps:$4 sm:$0xff]   ;;  %s2033_s1 = sadd.s32 256, %s1498_s10 }
  0x21   : > { %1567 = vmatprep.subr.msk.bf16.mxu0 %vm443_vm0, %v306_v0  ;;  %v445_v1 = vsel %vm443_vm0, %v306_v0, 0  ;;  %s262_s16 = sadd.s32 %s1437_s14, %s2867_s15  ;;  %1553 = vmatprep.subr.bf16.mxu1 %v1665_v7  ;;  %v1672_v30 = vld [vmem:[%s2725_s3 + $0x20] ss:$8 sps:$4 sm:$0xff]   ;;  %v1677_v31 = vld [vmem:[%s2725_s3 + $0x14] ss:$8 sps:$4 sm:$0xff]   ;;  %p1489_p0 = scmp.gt.s32.totalorder %s2033_s1, 300 }
  0x22   : > { %1518 = vmatpush3.bf16.msra.mxu0 %v445_v1  ;;  %s1438_s17 = sshll.u32 %s262_s16, 2  ;;  %v1675_v32 = vld [vmem:[%s2725_s3 + $0x10] ss:$8 sps:$4 sm:$0xff]   ;;  %v1680_v33 = vld [vmem:[%s2725_s3 + $0x4] ss:$8 sps:$4 sm:$0xff]  }
  0x23   : > { %764 = vmatprep.subr.bf16.mxu0 %v1659_v2  ;;  %s1907_s8 = scalar_lea.vmem %s2722_s0, %s1438_s17  ;;  %v1678_v34 = vld [vmem:[%s2725_s3] ss:$8 sps:$4 sm:$0xff]  }
  0x24   : > { %v1641_v8 = vld [vmem:[%s1907_s8] sm:$0xff]   ;;  %v1642_v9 = vld [vmem:[%s1907_s8 + $0x8] sm:$0xff]   ;;  %v1643_v10 = vld [vmem:[%s1907_s8 + $0x10] sm:$0xff]   ;;  %1561 = vmatpush1.bf16.msra.mxu1 %v1663_v11 }
  0x25   : > { %1519 = vmatprep.mubr.msk.bf16.mxu0 %vm394_vm1, %v1641_v8  ;;  %1554 = vmatprep.subr.bf16.mxu1 %v1668_v12  ;;  %v1644_v15 = vld [vmem:[%s1907_s8 + $0x18] sm:$0xff]   ;;  %v1645_v16 = vld [vmem:[%s1907_s8 + $0x20] sm:$0xff]   ;;  %v1646_v18 = vld [vmem:[%s1907_s8 + $0x28] sm:$0xff]  }
  0x26   : > { %1520 = vmatmul.mubr.msk.bf16.vlgmr.msra.gmra.mxu0 %vm394_vm1, %v1642_v9  ;;  %v1647_v19 = vld [vmem:[%s1907_s8 + $0x30] sm:$0xff]   ;;  %v1648_v20 = vld [vmem:[%s1907_s8 + $0x38] sm:$0xff]   ;;  %v1649_v21 = vld [vmem:[%s1907_s8 + $0x40] sm:$0xff]  }
  0x27   : > { %1523 = vmatprep.mubr.msk.bf16.mxu0 %vm394_vm1, %v1643_v10  ;;  %765 = vmatpush1.bf16.msra.mxu0 %v1657_v4  ;;  %v1650_v22 = vld [vmem:[%s1907_s8 + $0x48] sm:$0xff]   ;;  %v1651_v23 = vld [vmem:[%s1907_s8 + $0x50] sm:$0xff]   ;;  %v1652_v24 = vld [vmem:[%s1907_s8 + $0x58] sm:$0xff]  }
  0x28   : > { %766 = vmatprep.subr.bf16.mxu0 %v1662_v5  ;;  %1562 = vmatpush1.bf16.msra.mxu1 %v1666_v13  ;;  %v1653_v25 = vld [vmem:[%s1907_s8 + $0x60] sm:$0xff]   ;;  %v1654_v26 = vld [vmem:[%s1907_s8 + $0x68] sm:$0xff]   ;;  %v1655_v27 = vld [vmem:[%s1907_s8 + $0x70] sm:$0xff]  }
  0x29   : > { %1555 = vmatprep.subr.bf16.mxu1 %v1671_v14  ;;  %v1656_v28 = vld [vmem:[%s1907_s8 + $0x78] sm:$0xff]   ;;  %v1982_v38 = vld [vmem:[%s2724_s2] ss:$0 sm:$0xff] }
  0x2b   : > { %767 = vmatpush1.bf16.msra.mxu0 %v1660_v6 }
  0x2c   : > { %768 = vmatprep.subr.bf16.mxu0 %v1665_v7  ;;  %1563 = vmatpush1.bf16.msra.mxu1 %v1669_v17 }
  0x2d   : > { %1556 = vmatprep.subr.bf16.mxu1 %v1674_v29 }
  0x2e   : > { %1524 = vmatmul.mubr.msk.bf16.gmra.mxu0 %vm394_vm1, %v1644_v15 }
  0x2f   : > { %1527 = vmatprep.mubr.msk.bf16.mxu0 %vm394_vm1, %v1645_v16  ;;  %769 = vmatpush1.bf16.msra.mxu0 %v1663_v11 }
  0x30   : > { %770 = vmatprep.subr.bf16.mxu0 %v1668_v12  ;;  %1564 = vmatpush1.bf16.msra.mxu1 %v1672_v30 }
  0x31   : > { %1557 = vmatprep.subr.bf16.mxu1 %v1677_v31 }
  0x33   : > { %771 = vmatpush1.bf16.msra.mxu0 %v1666_v13 }
  0x34   : > { %772 = vmatprep.subr.bf16.mxu0 %v1671_v14  ;;  %1565 = vmatpush1.bf16.msra.mxu1 %v1675_v32 }
  0x35   : > { %1558 = vmatprep.subr.bf16.mxu1 %v1680_v33 }
  0x36   : > { %1528 = vmatmul.mubr.msk.bf16.gmra.mxu0 %vm394_vm1, %v1646_v18 }
  0x37   : > { %1531 = vmatprep.mubr.msk.bf16.mxu0 %vm394_vm1, %v1647_v19  ;;  %773 = vmatpush1.bf16.msra.mxu0 %v1669_v17 }
  0x38   : > { %774 = vmatprep.subr.bf16.mxu0 %v1674_v29  ;;  %1566 = vmatpush1.bf16.msra.mxu1 %v1678_v34 }
  0x3b   : > { %775 = vmatpush1.bf16.msra.mxu0 %v1672_v30 }
  0x3c   : > { %776 = vmatprep.subr.bf16.mxu0 %v1677_v31 }
  0x3e   : > { %1532 = vmatmul.mubr.msk.bf16.gmra.mxu0 %vm394_vm1, %v1648_v20 }
  0x3f   : > { %1535 = vmatprep.mubr.msk.bf16.mxu0 %vm394_vm1, %v1649_v21  ;;  %777 = vmatpush1.bf16.msra.mxu0 %v1675_v32 }
  0x40   : > { %778 = vmatprep.subr.bf16.mxu0 %v1680_v33 }
  0x43   : > { %779 = vmatpush1.bf16.msra.mxu0 %v1678_v34 }
  0x46   : > { %1536 = vmatmul.mubr.msk.bf16.gmra.mxu0 %vm394_vm1, %v1650_v22 }
  0x47   : > { %1539 = vmatprep.mubr.msk.bf16.mxu0 %vm394_vm1, %v1651_v23 }
  0x4e   : > { %1540 = vmatmul.mubr.msk.bf16.gmra.mxu0 %vm394_vm1, %v1652_v24 }
  0x4f   : > { %1543 = vmatprep.mubr.msk.bf16.mxu0 %vm394_vm1, %v1653_v25 }
  0x56   : > { %1544 = vmatmul.mubr.msk.bf16.gmra.mxu0 %vm394_vm1, %v1654_v26 }
  0x57   : > { %1547 = vmatprep.mubr.msk.bf16.mxu0 %vm394_vm1, %v1655_v27 }
  0x5e   : > { %1548 = vmatmul.mubr.msk.bf16.gmra.mxu0 %vm394_vm1, %v1656_v28 }
  0x5f   : > { %796 = vmatprep.mubr.bf16.mxu0 %v1776_v35 }
  0xe6   : > { %v1521_v36 = vpop.f32.mrf.mxu0 }
  0xe7   : > { %v490_v50 = vadd.f32 %v1521_v36, %v1982_v38 }
  0xe8   : > { %v481_v37 = vpop.f32.mrf.mxu0 }
  0xe9   : > { %v482_v40 = vadd.f32 %v1982_v38, %v481_v37  ;;  %v610_v54 = vmax.f32 %v490_v50, 0.0 }
  0xea   : > { %v1522_v39 = vpop.f32.mrf.mxu0 }
  0xeb   : > { %v608_v44 = vmax.f32 %v482_v40, 0.0  ;;  %v493_v47 = vadd.f32 %v1522_v39, %v1982_v38 }
  0xec   : > { %v484_v41 = vpop.f32.mrf.mxu0 }
  0xed   : > { %v485_v42 = vadd.f32 %v1982_v38, %v484_v41  ;;  %v611_v52 = vmax.f32 %v493_v47, 0.0 }
  0xee   : > { %v1525_v43 = vpop.f32.mrf.mxu0 }
  0xef   : > { %v609_v45 = vmax.f32 %v485_v42, 0.0  ;;  %v641_v56 = vpack.c.bf16 %v611_v52, %v610_v54  ;;  %v506_v9 = vadd.f32 %v1525_v43, %v1982_v38 }
  0xf0   : > { %v497_v46 = vpop.f32.mrf.mxu0 }
  0xf1   : > { %v640_v48 = vpack.c.bf16 %v609_v45, %v608_v44  ;;  %v498_v60 = vadd.f32 %v1982_v38, %v497_v46  ;;  %v614_v15 = vmax.f32 %v506_v9, 0.0 }
  0xf2   : > { %v1526_v49 = vpop.f32.mrf.mxu0 }
  0xf3   : > { %797 = vmatmul.mubr.bf16.vlgmr.msra.gmra.mxu0 %v640_v48  ;;  %v612_v3 = vmax.f32 %v498_v60, 0.0  ;;  %v509_v6 = vadd.f32 %v1526_v49, %v1982_v38 }
  0xf4   : > { %v500_v51 = vpop.f32.mrf.mxu0  ;;  %806 = vmatprep.mubr.bf16.mxu0 %v1776_v35 }
  0xf5   : > { %v501_v57 = vadd.f32 %v1982_v38, %v500_v51  ;;  %v615_v12 = vmax.f32 %v509_v6, 0.0 }
  0xf6   : > { %v1529_v53 = vpop.f32.mrf.mxu0 }
  0xf7   : > { %v522_v58 = vadd.f32 %v1529_v53, %v1982_v38  ;;  %v613_v63 = vmax.f32 %v501_v57, 0.0  ;;  %v643_v19 = vpack.c.bf16 %v615_v12, %v614_v15 }
  0xf8   : > { %v513_v55 = vpop.f32.mrf.mxu0 }
  0xf9   : > { %v618_v0 = vmax.f32 %v522_v58, 0.0  ;;  %v642_v7 = vpack.c.bf16 %v613_v63, %v612_v3  ;;  %v514_v24 = vadd.f32 %v1982_v38, %v513_v55 }
  0xfa   : > { %v1530_v59 = vpop.f32.mrf.mxu0 }
  0xfb   : > { %v525_v61 = vadd.f32 %v1530_v59, %v1982_v38  ;;  %807 = vmatmul.mubr.bf16.gmra.mxu0 %v641_v56  ;;  %v616_v29 = vmax.f32 %v514_v24, 0.0 }
  0xfc   : > { %v516_v62 = vpop.f32.mrf.mxu0  ;;  %816 = vmatprep.mubr.bf16.mxu0 %v1776_v35 }
  0xfd   : > { %v619_v1 = vmax.f32 %v525_v61, 0.0  ;;  %v517_v20 = vadd.f32 %v1982_v38, %v516_v62 }
  0xfe   : > { %v1533_v2 = vpop.f32.mrf.mxu0 }
  0xff   : > { %v645_v4 = vpack.c.bf16 %v619_v1, %v618_v0  ;;  %v538_v25 = vadd.f32 %v1533_v2, %v1982_v38  ;;  %v617_v26 = vmax.f32 %v517_v20, 0.0 }
 0x100   : > { %v529_v5 = vpop.f32.mrf.mxu0 }
 0x101   : > { %847 = vmatmul.mubr.bf16.vlgmr.msra.gmra.mxu1 %v645_v4  ;;  %v530_v10 = vadd.f32 %v1982_v38, %v529_v5  ;;  %v622_v30 = vmax.f32 %v538_v25, 0.0  ;;  %v644_v31 = vpack.c.bf16 %v617_v26, %v616_v29 }
 0x102   : > { %v1534_v8 = vpop.f32.mrf.mxu0  ;;  %856 = vmatprep.mubr.bf16.mxu1 %v1776_v35 }
 0x103   : > { %817 = vmatmul.mubr.bf16.gmra.mxu0 %v642_v7  ;;  %v620_v16 = vmax.f32 %v530_v10, 0.0  ;;  %v541_v21 = vadd.f32 %v1534_v8, %v1982_v38 }
 0x104   : > { %v532_v11 = vpop.f32.mrf.mxu0  ;;  %826 = vmatprep.mubr.bf16.mxu0 %v1776_v35 }
 0x105   : > { %v533_v13 = vadd.f32 %v1982_v38, %v532_v11  ;;  %v623_v27 = vmax.f32 %v541_v21, 0.0 }
 0x106   : > { %v1537_v14 = vpop.f32.mrf.mxu0 }
 0x107   : > { %v621_v17 = vmax.f32 %v533_v13, 0.0  ;;  %v647_v32 = vpack.c.bf16 %v623_v27, %v622_v30  ;;  %v554_v41 = vadd.f32 %v1537_v14, %v1982_v38 }
 0x108   : > { %v545_v18 = vpop.f32.mrf.mxu0 }
 0x109   : > { %v646_v22 = vpack.c.bf16 %v621_v17, %v620_v16  ;;  %v546_v33 = vadd.f32 %v1982_v38, %v545_v18  ;;  %v626_v45 = vmax.f32 %v554_v41, 0.0 }
 0x10a   : > { %v1538_v23 = vpop.f32.mrf.mxu0 }
 0x10b   : > { %827 = vmatmul.mubr.bf16.gmra.mxu0 %v643_v19  ;;  %857 = vmatmul.mubr.bf16.gmra.mxu1 %v646_v22  ;;  %v624_v37 = vmax.f32 %v546_v33, 0.0  ;;  %v557_v42 = vadd.f32 %v1538_v23, %v1982_v38  ;;  %v674_v23 = vlaneseq }
 0x10c   : > { %836 = vmatprep.mubr.bf16.mxu0 %v1776_v35  ;;  %866 = vmatprep.mubr.bf16.mxu1 %v1776_v35  ;;  %v548_v28 = vpop.f32.mrf.mxu0 }
 0x10d   : > { %v549_v34 = vadd.f32 %v1982_v38, %v548_v28  ;;  %v627_v46 = vmax.f32 %v557_v42, 0.0  ;;  %v2035_v24 = vshrl.u32 %v674_v23, 7 }
 0x10e   : > { %v1541_v36 = vpop.f32.mrf.mxu0 }
 0x10f   : > { %v625_v39 = vmax.f32 %v549_v34, 0.0  ;;  %v649_v48 = vpack.c.bf16 %v627_v46, %v626_v45  ;;  %v570_v55 = vadd.f32 %v1541_v36, %v1982_v38  ;;  %2765 = vst [vmem:[#allocation6_spill] sm:$0xff] %v2035_v24  ;;  %v676_v25 = vsub.s32 0, %v2035_v24 }
 0x110   : > { %v561_v40 = vpop.f32.mrf.mxu0  ;;  %v680_v26 = vsub.s32 1, %v2035_v24 }
 0x111   : > { %v648_v43 = vpack.c.bf16 %v625_v39, %v624_v37  ;;  %v562_v49 = vadd.f32 %v1982_v38, %v561_v40  ;;  %v630_v59 = vmax.f32 %v570_v55, 0.0 }
 0x112   : > { %v1542_v44 = vpop.f32.mrf.mxu0 }
 0x113   : > { %837 = vmatmul.mubr.bf16.gmra.mxu0 %v644_v31  ;;  %867 = vmatmul.mubr.bf16.gmra.mxu1 %v647_v32  ;;  %v628_v52 = vmax.f32 %v562_v49, 0.0  ;;  %v573_v56 = vadd.f32 %v1542_v44, %v1982_v38 }
 0x114   : > { %876 = vmatprep.mubr.bf16.mxu1 %v1776_v35  ;;  %v564_v47 = vpop.f32.mrf.mxu0 }
 0x115   : > { %v565_v50 = vadd.f32 %v1982_v38, %v564_v47  ;;  %v631_v60 = vmax.f32 %v573_v56, 0.0 }
 0x116   : > { %v1545_v51 = vpop.f32.mrf.mxu0 }
 0x117   : > { %v629_v53 = vmax.f32 %v565_v50, 0.0  ;;  %v651_v62 = vpack.c.bf16 %v631_v60, %v630_v59  ;;  %v586_v5 = vadd.f32 %v1545_v51, %v1982_v38 }
 0x118   : > { %v577_v54 = vpop.f32.mrf.mxu0 }
 0x119   : > { %v650_v57 = vpack.c.bf16 %v629_v53, %v628_v52  ;;  %v578_v63 = vadd.f32 %v1982_v38, %v577_v54  ;;  %v634_v9 = vmax.f32 %v586_v5, 0.0 }
 0x11a   : > { %v1546_v58 = vpop.f32.mrf.mxu0 }
 0x11b   : > { %877 = vmatmul.mubr.bf16.gmra.mxu1 %v648_v43  ;;  %v632_v2 = vmax.f32 %v578_v63, 0.0  ;;  %v589_v6 = vadd.f32 %v1546_v58, %v1982_v38 }
 0x11c   : > { %886 = vmatprep.mubr.bf16.mxu1 %v1776_v35  ;;  %v580_v61 = vpop.f32.mrf.mxu0 }
 0x11d   : > { %v581_v0 = vadd.f32 %v1982_v38, %v580_v61  ;;  %v635_v10 = vmax.f32 %v589_v6, 0.0 }
 0x11e   : > { %v1549_v1 = vpop.f32.mrf.mxu0 }
 0x11f   : > { %v633_v3 = vmax.f32 %v581_v0, 0.0  ;;  %v653_v12 = vpack.c.bf16 %v635_v10, %v634_v9  ;;  %v602_v17 = vadd.f32 %v1549_v1, %v1982_v38 }
 0x120   : > { %v593_v4 = vpop.f32.mrf.mxu0 }
 0x121   : > { %v652_v7 = vpack.c.bf16 %v633_v3, %v632_v2  ;;  %v594_v13 = vadd.f32 %v1982_v38, %v593_v4  ;;  %v638_v20 = vmax.f32 %v602_v17, 0.0 }
 0x122   : > { %v1550_v8 = vpop.f32.mrf.mxu0 }
 0x123   : > { %887 = vmatmul.mubr.bf16.gmra.mxu1 %v649_v48  ;;  %v636_v15 = vmax.f32 %v594_v13, 0.0  ;;  %v605_v18 = vadd.f32 %v1550_v8, %v1982_v38 }
 0x124   : > { %896 = vmatprep.mubr.bf16.mxu1 %v1776_v35  ;;  %v596_v11 = vpop.f32.mrf.mxu0 }
 0x125   : > { %v597_v14 = vadd.f32 %v1982_v38, %v596_v11  ;;  %v639_v21 = vmax.f32 %v605_v18, 0.0  ;;  %v672_v38 = vld [vmem:[%s2726_s4] sm:$0x3] }
 0x126   : > { %v2044_v27 = vrot.slane %v672_v38, %v680_v26 }
 0x127   : > { %v637_v16 = vmax.f32 %v597_v14, 0.0  ;;  %v655_v22 = vpack.c.bf16 %v639_v21, %v638_v20 }
 0x129   : > { %v654_v19 = vpack.c.bf16 %v637_v16, %v636_v15 }
 0x12b   : > { %897 = vmatmul.mubr.bf16.gmra.mxu1 %v650_v57 }
 0x12c   : > { %906 = vmatprep.mubr.bf16.mxu1 %v1776_v35 }
 0x133   : > { %907 = vmatmul.mubr.bf16.gmra.mxu1 %v651_v62 }
 0x134   : > { %916 = vmatprep.mubr.bf16.mxu1 %v1776_v35 }
 0x13b   : > { %917 = vmatmul.mubr.bf16.gmra.mxu1 %v652_v7 }
 0x13c   : > { %926 = vmatprep.mubr.bf16.mxu1 %v1776_v35 }
 0x143   : > { %927 = vmatmul.mubr.bf16.gmra.mxu1 %v653_v12 }
 0x144   : > { %936 = vmatprep.mubr.bf16.mxu1 %v1776_v35 }
 0x14b   : > { %937 = vmatmul.mubr.bf16.gmra.mxu1 %v654_v19 }
 0x14c   : > { %946 = vmatprep.mubr.bf16.mxu1 %v1776_v35  ;;  %v2042_v35 = vrot.slane %v672_v38, %v676_v25 }
 0x153   : > { %947 = vmatmul.mubr.bf16.gmra.mxu1 %v655_v22 }
 0x1b3   : > { %v798_v28 = vpop.f32.mrf.mxu0 }
 0x1b4   : > { %v2047_v29 = vadd.f32 %v798_v28, %v2042_v35 }
 0x1b5   : > { %v800_v30 = vpop.f32.mrf.mxu0 }
 0x1b6   : > { %v2050_v31 = vadd.f32 %v800_v30, %v2044_v27 }
 0x1b7   : > { %v802_v32 = vpop.f32.mrf.mxu0 }
 0x1b8   : > { %2766 = vst [vmem:[#allocation7_spill] sm:$0xff] %v2050_v31  ;;  %v2053_v33 = vadd.f32 %v802_v32, %v2042_v35 }
 0x1b9   : > { %v804_v34 = vpop.f32.mrf.mxu0 }
 0x1ba   : > { %2767 = vst [vmem:[#allocation8_spill] sm:$0xff] %v2053_v33  ;;  %v2056_v36 = vadd.f32 %v804_v34, %v2044_v27 }
 0x1bb   : > { %v808_v37 = vpop.f32.mrf.mxu0 }
 0x1bc   : > { %2768 = vst [vmem:[#allocation9_spill] sm:$0xff] %v2056_v36  ;;  %v2059_v39 = vadd.f32 %v808_v37, %v2042_v35 }
 0x1bd   : > { %v810_v40 = vpop.f32.mrf.mxu0 }
 0x1be   : > { %2769 = vst [vmem:[#allocation10_spill] sm:$0xff] %v2059_v39  ;;  %v2062_v41 = vadd.f32 %v810_v40, %v2044_v27 }
 0x1bf   : > { %v812_v42 = vpop.f32.mrf.mxu0 }
 0x1c0   : > { %2770 = vst [vmem:[#allocation11_spill] sm:$0xff] %v2062_v41  ;;  %v2065_v43 = vadd.f32 %v812_v42, %v2042_v35 }
 0x1c1   : > { %v814_v44 = vpop.f32.mrf.mxu0  ;;  %v848_v45 = vpop.f32.mrf.mxu1 }
 0x1c2   : > { %2771 = vst [vmem:[#allocation12_spill] sm:$0xff] %v2065_v43  ;;  %v2068_v46 = vadd.f32 %v814_v44, %v2044_v27  ;;  %v2071_v47 = vadd.f32 %v848_v45, %v2042_v35 }
 0x1c3   : > { %v818_v48 = vpop.f32.mrf.mxu0  ;;  %v850_v49 = vpop.f32.mrf.mxu1 }
 0x1c4   : > { %2772 = vst [vmem:[#allocation13_spill] sm:$0xff] %v2068_v46  ;;  %v2074_v50 = vadd.f32 %v818_v48, %v2042_v35  ;;  %v2077_v51 = vadd.f32 %v850_v49, %v2044_v27 }
 0x1c5   : > { %v820_v52 = vpop.f32.mrf.mxu0  ;;  %v852_v53 = vpop.f32.mrf.mxu1 }
 0x1c6   : > { %v2080_v54 = vadd.f32 %v820_v52, %v2044_v27  ;;  %v2083_v55 = vadd.f32 %v852_v53, %v2042_v35 }
 0x1c7   : > { %v822_v56 = vpop.f32.mrf.mxu0  ;;  %v854_v57 = vpop.f32.mrf.mxu1 }
 0x1c8   : > { %v2086_v58 = vadd.f32 %v822_v56, %v2042_v35  ;;  %v2089_v59 = vadd.f32 %v854_v57, %v2044_v27 }
 0x1c9   : > { %v824_v60 = vpop.f32.mrf.mxu0 }
 0x1ca   : > { %v2092_v61 = vadd.f32 %v824_v60, %v2044_v27 }
 0x1cb   : > { %v828_v62 = vpop.f32.mrf.mxu0  ;;  %v858_v63 = vpop.f32.mrf.mxu1 }
 0x1cc   : > { %v2095_v0 = vadd.f32 %v828_v62, %v2042_v35  ;;  %v2098_v1 = vadd.f32 %v858_v63, %v2042_v35 }
 0x1cd   : > { %v830_v2 = vpop.f32.mrf.mxu0  ;;  %v860_v3 = vpop.f32.mrf.mxu1 }
 0x1ce   : > { %v2101_v4 = vadd.f32 %v830_v2, %v2044_v27  ;;  %v2104_v5 = vadd.f32 %v860_v3, %v2044_v27 }
 0x1cf   : > { %v832_v6 = vpop.f32.mrf.mxu0  ;;  %v862_v7 = vpop.f32.mrf.mxu1 }
 0x1d0   : > { %v2107_v8 = vadd.f32 %v832_v6, %v2042_v35  ;;  %v2110_v9 = vadd.f32 %v862_v7, %v2042_v35 }
 0x1d1   : > { %v834_v10 = vpop.f32.mrf.mxu0  ;;  %v864_v11 = vpop.f32.mrf.mxu1 }
 0x1d2   : > { %v2113_v12 = vadd.f32 %v834_v10, %v2044_v27  ;;  %v2116_v13 = vadd.f32 %v864_v11, %v2044_v27 }
 0x1d3   : > { %v838_v14 = vpop.f32.mrf.mxu0  ;;  %v868_v15 = vpop.f32.mrf.mxu1 }
 0x1d4   : > { %v2119_v16 = vadd.f32 %v838_v14, %v2042_v35  ;;  %v2122_v17 = vadd.f32 %v868_v15, %v2042_v35 }
 0x1d5   : > { %v840_v18 = vpop.f32.mrf.mxu0  ;;  %v870_v19 = vpop.f32.mrf.mxu1 }
 0x1d6   : > { %v2125_v20 = vadd.f32 %v840_v18, %v2044_v27  ;;  %v2128_v21 = vadd.f32 %v870_v19, %v2044_v27 }
 0x1d7   : > { %v842_v22 = vpop.f32.mrf.mxu0  ;;  %v872_v23 = vpop.f32.mrf.mxu1 }
 0x1d8   : > { %v2131_v25 = vadd.f32 %v842_v22, %v2042_v35  ;;  %v2134_v38 = vadd.f32 %v872_v23, %v2042_v35 }
 0x1d9   : > { %v844_v26 = vpop.f32.mrf.mxu0  ;;  %v874_v28 = vpop.f32.mrf.mxu1 }
 0x1da   : > { %v2137_v30 = vadd.f32 %v844_v26, %v2044_v27  ;;  %v2140_v32 = vadd.f32 %v874_v28, %v2044_v27 }
 0x1db   : > { %v878_v34 = vpop.f32.mrf.mxu1 }
 0x1dc   : > { %v2143_v37 = vadd.f32 %v878_v34, %v2042_v35 }
 0x1dd   : > { %v880_v40 = vpop.f32.mrf.mxu1 }
 0x1de   : > { %2773 = vst [vmem:[#allocation14_spill] sm:$0xff] %v2143_v37  ;;  %v2146_v42 = vadd.f32 %v880_v40, %v2044_v27 }
 0x1df   : > { %v882_v44 = vpop.f32.mrf.mxu1 }
 0x1e0   : > { %v2149_v45 = vadd.f32 %v882_v44, %v2042_v35 }
 0x1e1   : > { %v884_v48 = vpop.f32.mrf.mxu1 }
 0x1e2   : > { %2774 = vst [vmem:[#allocation15_spill] sm:$0xff] %v2149_v45  ;;  %v2152_v49 = vadd.f32 %v884_v48, %v2044_v27 }
 0x1e3   : > { %v888_v52 = vpop.f32.mrf.mxu1 }
 0x1e4   : > { %v2155_v53 = vadd.f32 %v888_v52, %v2042_v35 }
 0x1e5   : > { %v890_v56 = vpop.f32.mrf.mxu1 }
 0x1e6   : > { %2775 = vst [vmem:[#allocation16_spill] sm:$0xff] %v2155_v53  ;;  %v2158_v57 = vadd.f32 %v890_v56, %v2044_v27 }
 0x1e7   : > { %v892_v60 = vpop.f32.mrf.mxu1 }
 0x1e8   : > { %v2161_v62 = vadd.f32 %v892_v60, %v2042_v35 }
 0x1e9   : > { %v894_v63 = vpop.f32.mrf.mxu1 }
 0x1ea   : > { %2776 = vst [vmem:[#allocation17_spill] sm:$0xff] %v2161_v62  ;;  %v2164_v2 = vadd.f32 %v894_v63, %v2044_v27 }
 0x1eb   : > { %v898_v3 = vpop.f32.mrf.mxu1 }
 0x1ec   : > { %2777 = vst [vmem:[#allocation18_spill] sm:$0xff] %v2164_v2  ;;  %v2167_v6 = vadd.f32 %v898_v3, %v2042_v35 }
 0x1ed   : > { %v900_v7 = vpop.f32.mrf.mxu1 }
 0x1ee   : > { %2778 = vst [vmem:[#allocation19_spill] sm:$0xff] %v2167_v6  ;;  %v2170_v10 = vadd.f32 %v900_v7, %v2044_v27 }
 0x1ef   : > { %v902_v11 = vpop.f32.mrf.mxu1 }
 0x1f0   : > { %2779 = vst [vmem:[#allocation20_spill] sm:$0xff] %v2170_v10  ;;  %v2173_v14 = vadd.f32 %v902_v11, %v2042_v35 }
 0x1f1   : > { %v904_v15 = vpop.f32.mrf.mxu1 }
 0x1f2   : > { %2780 = vst [vmem:[#allocation21_spill] sm:$0xff] %v2173_v14  ;;  %v2176_v18 = vadd.f32 %v904_v15, %v2044_v27 }
 0x1f3   : > { %v908_v19 = vpop.f32.mrf.mxu1 }
 0x1f4   : > { %2781 = vst [vmem:[#allocation22_spill] sm:$0xff] %v2176_v18  ;;  %v2179_v22 = vadd.f32 %v908_v19, %v2042_v35 }
 0x1f5   : > { %v910_v23 = vpop.f32.mrf.mxu1 }
 0x1f6   : > { %2782 = vst [vmem:[#allocation23_spill] sm:$0xff] %v2179_v22  ;;  %v2182_v26 = vadd.f32 %v910_v23, %v2044_v27 }
 0x1f7   : > { %v912_v28 = vpop.f32.mrf.mxu1 }
 0x1f8   : > { %2783 = vst [vmem:[#allocation24_spill] sm:$0xff] %v2182_v26  ;;  %v2185_v34 = vadd.f32 %v912_v28, %v2042_v35 }
 0x1f9   : > { %v914_v40 = vpop.f32.mrf.mxu1 }
 0x1fa   : > { %2784 = vst [vmem:[#allocation25_spill] sm:$0xff] %v2185_v34  ;;  %v2188_v44 = vadd.f32 %v914_v40, %v2044_v27 }
 0x1fb   : > { %v918_v48 = vpop.f32.mrf.mxu1 }
 0x1fc   : > { %2785 = vst [vmem:[#allocation26_spill] sm:$0xff] %v2188_v44  ;;  %v2191_v52 = vadd.f32 %v918_v48, %v2042_v35 }
 0x1fd   : > { %v920_v56 = vpop.f32.mrf.mxu1 }
 0x1fe   : > { %2786 = vst [vmem:[#allocation27_spill] sm:$0xff] %v2191_v52  ;;  %v2194_v60 = vadd.f32 %v920_v56, %v2044_v27 }
 0x1ff   : > { %v922_v63 = vpop.f32.mrf.mxu1 }
 0x200   : > { %2787 = vst [vmem:[#allocation28_spill] sm:$0xff] %v2194_v60  ;;  %v2197_v3 = vadd.f32 %v922_v63, %v2042_v35 }
 0x201   : > { %v924_v7 = vpop.f32.mrf.mxu1 }
 0x202   : > { %2788 = vst [vmem:[#allocation29_spill] sm:$0xff] %v2197_v3  ;;  %v2200_v11 = vadd.f32 %v924_v7, %v2044_v27 }
 0x203   : > { %v928_v15 = vpop.f32.mrf.mxu1 }
 0x204   : > { %2789 = vst [vmem:[#allocation30_spill] sm:$0xff] %v2200_v11  ;;  %v2203_v19 = vadd.f32 %v928_v15, %v2042_v35 }
 0x205   : > { %v930_v23 = vpop.f32.mrf.mxu1 }
 0x206   : > { %2790 = vst [vmem:[#allocation31_spill] sm:$0xff] %v2203_v19  ;;  %v2206_v28 = vadd.f32 %v930_v23, %v2044_v27 }
 0x207   : > { %v932_v40 = vpop.f32.mrf.mxu1 }
 0x208   : > { %2791 = vst [vmem:[#allocation32_spill] sm:$0xff] %v2206_v28  ;;  %v2209_v48 = vadd.f32 %v932_v40, %v2042_v35 }
 0x209   : > { %v934_v56 = vpop.f32.mrf.mxu1 }
 0x20a   : > { %2792 = vst [vmem:[#allocation33_spill] sm:$0xff] %v2209_v48  ;;  %v2212_v63 = vadd.f32 %v934_v56, %v2044_v27 }
 0x20b   : > { %v938_v24 = vpop.f32.mrf.mxu1 }
 0x20c   : > { %2793 = vst [vmem:[#allocation34_spill] sm:$0xff] %v2212_v63  ;;  %v2215_v7 = vadd.f32 %v938_v24, %v2042_v35 }
 0x20d   : > { %v940_v11 = vpop.f32.mrf.mxu1 }
 0x20e   : > { %2794 = vst [vmem:[#allocation35_spill] sm:$0xff] %v2215_v7  ;;  %v2218_v15 = vadd.f32 %v940_v11, %v2044_v27 }
 0x20f   : > { %v942_v19 = vpop.f32.mrf.mxu1 }
 0x210   : > { %2795 = vst [vmem:[#allocation36_spill] sm:$0xff] %v2218_v15  ;;  %v2221_v23 = vadd.f32 %v942_v19, %v2042_v35 }
 0x211   : > { %v944_v28 = vpop.f32.mrf.mxu1 }
 0x212   : > { %2796 = vst [vmem:[#allocation37_spill] sm:$0xff] %v2221_v23  ;;  %v2224_v40 = vadd.f32 %v944_v28, %v2044_v27 }
 0x213   : > { %v948_v48 = vpop.f32.mrf.mxu1 }
 0x214   : > { %2797 = vst [vmem:[#allocation38_spill] sm:$0xff] %v2224_v40  ;;  %v2227_v56 = vadd.f32 %v948_v48, %v2042_v35 }
 0x215   : > { %v950_v63 = vpop.f32.mrf.mxu1 }
 0x216   : > { %2798 = vst [vmem:[#allocation39_spill] sm:$0xff] %v2227_v56  ;;  %v2230_v24 = vadd.f32 %v950_v63, %v2044_v27 }
 0x217   : > { %v952_v7 = vpop.f32.mrf.mxu1 }
 0x218   : > { %2799 = vst [vmem:[#allocation40_spill] sm:$0xff] %v2230_v24  ;;  %v2233_v11 = vadd.f32 %v952_v7, %v2042_v35  ;;  %964 = sbr.rel (%p1489_p0) target bundleno = 576 (0x240), region = 48 }
 0x219   : > { %v954_v15 = vpop.f32.mrf.mxu1 }
 0x21a   : > { %2800 = vst [vmem:[#allocation41_spill] sm:$0xff] %v2233_v11  ;;  %v2236_v19 = vadd.f32 %v954_v15, %v2044_v27 }
 0x21c   : > { %2801 = vst [vmem:[#allocation42_spill] sm:$0xff] %v2236_v19 }
 0x21d   : > { %v965_v28 = vmax.f32 %v2047_v29, %v2059_v39  ;;  %v966_v48 = vmax.f32 %v2053_v33, %v2065_v43  ;;  %v996_v63 = vmax.f32 %v2050_v31, %v2062_v41  ;;  %v997_v35 = vmax.f32 %v2056_v36, %v2068_v46  ;;  %v2803_v36 = vld [vmem:[#allocation31_spill] sm:$0xff]  ;;  %v2804_v31 = vld [vmem:[#allocation33_spill] sm:$0xff] }
 0x21f   : > { %v967_v7 = vmax.f32 %v965_v28, %v2074_v50  ;;  %v968_v27 = vmax.f32 %v966_v48, %v2086_v58  ;;  %v998_v15 = vmax.f32 %v996_v63, %v2080_v54  ;;  %v999_v19 = vmax.f32 %v997_v35, %v2092_v61 }
 0x221   : > { %v969_v24 = vmax.f32 %v967_v7, %v2095_v0  ;;  %v970_v39 = vmax.f32 %v968_v27, %v2107_v8  ;;  %v1000_v43 = vmax.f32 %v998_v15, %v2101_v4  ;;  %v1001_v33 = vmax.f32 %v999_v19, %v2113_v12 }
 0x223   : > { %v971_v41 = vmax.f32 %v969_v24, %v2119_v16  ;;  %v972_v46 = vmax.f32 %v970_v39, %v2131_v25  ;;  %v1002_v28 = vmax.f32 %v1000_v43, %v2125_v20  ;;  %v1003_v48 = vmax.f32 %v1001_v33, %v2137_v30 }
 0x225   : > { %v973_v63 = vmax.f32 %v971_v41, %v2071_v47  ;;  %v974_v35 = vmax.f32 %v972_v46, %v2083_v55  ;;  %v1004_v7 = vmax.f32 %v1002_v28, %v2077_v51  ;;  %v1005_v27 = vmax.f32 %v1003_v48, %v2089_v59 }
 0x227   : > { %v975_v15 = vmax.f32 %v973_v63, %v2098_v1  ;;  %v976_v19 = vmax.f32 %v974_v35, %v2110_v9  ;;  %v1006_v24 = vmax.f32 %v1004_v7, %v2104_v5  ;;  %v1007_v39 = vmax.f32 %v1005_v27, %v2116_v13 }
 0x229   : > { %v977_v43 = vmax.f32 %v975_v15, %v2122_v17  ;;  %v978_v33 = vmax.f32 %v976_v19, %v2134_v38  ;;  %v1008_v41 = vmax.f32 %v1006_v24, %v2128_v21  ;;  %v1009_v46 = vmax.f32 %v1007_v39, %v2140_v32 }
 0x22b   : > { %v979_v28 = vmax.f32 %v977_v43, %v2143_v37  ;;  %v980_v48 = vmax.f32 %v978_v33, %v2149_v45  ;;  %v1010_v63 = vmax.f32 %v1008_v41, %v2146_v42  ;;  %v1011_v35 = vmax.f32 %v1009_v46, %v2152_v49 }
 0x22d   : > { %v981_v7 = vmax.f32 %v979_v28, %v2155_v53  ;;  %v982_v27 = vmax.f32 %v980_v48, %v2161_v62  ;;  %v1012_v15 = vmax.f32 %v1010_v63, %v2158_v57  ;;  %v1013_v19 = vmax.f32 %v1011_v35, %v2164_v2 }
 0x22f   : > { %v983_v24 = vmax.f32 %v981_v7, %v2167_v6  ;;  %v984_v39 = vmax.f32 %v982_v27, %v2173_v14  ;;  %v1014_v43 = vmax.f32 %v1012_v15, %v2170_v10  ;;  %v1015_v33 = vmax.f32 %v1013_v19, %v2176_v18  ;;  %v2802_v27 = vld [vmem:[#allocation30_spill] sm:$0xff] }
 0x231   : > { %v985_v41 = vmax.f32 %v983_v24, %v2179_v22  ;;  %v986_v46 = vmax.f32 %v984_v39, %v2185_v34  ;;  %v1016_v28 = vmax.f32 %v1014_v43, %v2182_v26  ;;  %v1017_v48 = vmax.f32 %v1015_v33, %v2188_v44  ;;  %v2805_v22 = vld [vmem:[#allocation32_spill] sm:$0xff]  ;;  %v2806_v34 = vld [vmem:[#allocation34_spill] sm:$0xff]  ;;  %v2807_v33 = vld [vmem:[#allocation35_spill] sm:$0xff] }
 0x233   : > { %v987_v63 = vmax.f32 %v985_v41, %v2191_v52  ;;  %v988_v35 = vmax.f32 %v986_v46, %v2197_v3  ;;  %v1018_v7 = vmax.f32 %v1016_v28, %v2194_v60  ;;  %v1019_v15 = vmax.f32 %v1017_v48, %v2802_v27  ;;  %v2808_v46 = vld [vmem:[#allocation36_spill] sm:$0xff]  ;;  %v1028_v27 = vld [vmem:[%s1890_s27 + $0x8] sm:$0xff] }
 0x235   : > { %v989_v19 = vmax.f32 %v987_v63, %v2803_v36  ;;  %v990_v24 = vmax.f32 %v988_v35, %v2804_v31  ;;  %v1020_v39 = vmax.f32 %v1018_v7, %v2805_v22  ;;  %v1021_v43 = vmax.f32 %v1019_v15, %v2806_v34  ;;  %v2809_v63 = vld [vmem:[#allocation40_spill] sm:$0xff]  ;;  %v2810_v35 = vld [vmem:[#allocation42_spill] sm:$0xff] }
 0x236   : > { %v1027_v7 = vld [vmem:[%s1890_s27] sm:$0xff] }
 0x237   : > { %v991_v41 = vmax.f32 %v989_v19, %v2807_v33  ;;  %v992_v52 = vmax.f32 %v990_v24, %v2221_v23  ;;  %v1022_v3 = vmax.f32 %v1020_v39, %v2808_v46  ;;  %v1023_v28 = vmax.f32 %v1021_v43, %v2224_v40 }
 0x239   : > { %v993_v48 = vmax.f32 %v991_v41, %v2227_v56  ;;  %v994_v36 = vmax.f32 %v992_v52, %v2233_v11  ;;  %v1024_v31 = vmax.f32 %v1022_v3, %v2809_v63  ;;  %v1025_v22 = vmax.f32 %v1023_v28, %v2810_v35 }
 0x23b   : > { %v995_v34 = vmax.f32 %v993_v48, %v994_v36  ;;  %v1026_v15 = vmax.f32 %v1024_v31, %v1025_v22 }
 0x23d   : > { %v1029_v60 = vmax.f32 %v1027_v7, %v995_v34  ;;  %v1030_v19 = vmax.f32 %v1028_v27, %v1026_v15 }
 0x23f   : > { %1031 = vst [vmem:[%s1890_s27] sm:$0xff] %v1029_v60  ;;  %1032 = vst [vmem:[%s1890_s27 + $0x8] sm:$0xff] %v1030_v19 }
 0x240 PF: > { %p1490_p1 = scmp.le.s32.totalorder %s2033_s1, 300 }
 0x242   : > { %1035 = sbr.rel (%p1490_p1) target bundleno = 654 (0x28e), region = 52 }
 0x247   : > { %v2811_v24 = vld [vmem:[#allocation6_spill] sm:$0xff]  ;;  %v2313_v43 = vstv %s1498_s10 }
 0x248   : > { %v1042_v39 = vadd.s32 32, %v2811_v24  ;;  %v1043_v52 = vadd.s32 40, %v2811_v24  ;;  %v1044_v3 = vadd.s32 48, %v2811_v24  ;;  %v1045_v33 = vadd.s32 56, %v2811_v24 }
 0x249   : > { %v1046_v41 = vadd.s32 64, %v2811_v24  ;;  %v1039_v28 = vadd.s32 8, %v2811_v24  ;;  %v1040_v48 = vadd.s32 16, %v2811_v24  ;;  %v1041_v63 = vadd.s32 24, %v2811_v24 }
 0x24a   : > { %v2318_v60 = vadd.s32 %v2313_v43, %v1042_v39  ;;  %v2321_v46 = vadd.s32 %v2313_v43, %v1043_v52  ;;  %v2326_v36 = vadd.s32 %v2313_v43, %v1044_v3  ;;  %v1047_v31 = vadd.s32 72, %v2811_v24 }
 0x24b   : > { %v1048_v35 = vadd.s32 80, %v2811_v24  ;;  %v2332_v22 = vadd.s32 %v2313_v43, %v1045_v33  ;;  %v1049_v7 = vadd.s32 88, %v2811_v24  ;;  %v1050_v27 = vadd.s32 96, %v2811_v24 }
 0x24c   : > { %v1051_v34 = vadd.s32 104, %v2811_v24  ;;  %v1052_v15 = vadd.s32 112, %v2811_v24  ;;  %v1053_v19 = vadd.s32 120, %v2811_v24  ;;  %v2340_v39 = vadd.s32 %v2313_v43, %v1046_v41 }
 0x24d   : > { %vm1107_vm2 = vcmp.lt.s32.totalorder %v2318_v60, 300  ;;  %vm1108_vm3 = vcmp.lt.s32.totalorder %v2321_v46, 300  ;;  %v1054_v52 = vadd.s32 128, %v2811_v24  ;;  %v1055_v3 = vadd.s32 136, %v2811_v24 }
 0x24e   : > { %v1056_v33 = vadd.s32 144, %v2811_v24  ;;  %vm1109_vm4 = vcmp.lt.s32.totalorder %v2326_v36, 300  ;;  %v1057_v40 = vadd.s32 152, %v2811_v24  ;;  %v1058_v11 = vadd.s32 160, %v2811_v24 }
 0x24f   : > { %v2351_v56 = vadd.s32 %v2313_v43, %v1047_v31  ;;  %vm1110_vm5 = vcmp.lt.s32.totalorder %v2332_v22, 300  ;;  %v1059_v41 = vadd.s32 168, %v2811_v24  ;;  %v1060_v23 = vadd.s32 176, %v2811_v24 }
 0x250   : > { %v1208_v44 = vsel %vm1107_vm2, %v2080_v54, -inf  ;;  %v1210_v26 = vsel %vm1108_vm3, %v2092_v61, -inf  ;;  %v2363_v14 = vadd.s32 %v2313_v43, %v1048_v35  ;;  %vm1111_vm6 = vcmp.lt.s32.totalorder %v2340_v39, 300 }
 0x251   : > { %v1296_v31 = vmax.f32 %v1210_v26, %v1208_v44  ;;  %v1212_v6 = vsel %vm1109_vm4, %v2101_v4, -inf  ;;  %v1061_v18 = vadd.s32 184, %v2811_v24  ;;  %v2371_v62 = vadd.s32 192, %v2811_v24 }
 0x252   : > { %v2374_v54 = vadd.s32 200, %v2811_v24  ;;  %v1214_v61 = vsel %vm1110_vm5, %v2113_v12, -inf  ;;  %v2380_v35 = vadd.s32 208, %v2811_v24  ;;  %v2383_v26 = vadd.s32 %v2313_v43, %v1049_v7 }
 0x253   : > { %vm1112_vm7 = vcmp.lt.s32.totalorder %v2351_v56, 300  ;;  %v1297_v4 = vmax.f32 %v1212_v6, %v1296_v31  ;;  %v2387_v44 = vadd.s32 216, %v2811_v24  ;;  %v2390_v53 = vadd.s32 224, %v2811_v24 }
 0x254   : > { %v2393_v10 = vadd.s32 232, %v2811_v24  ;;  %v1216_v12 = vsel %vm1111_vm6, %v2125_v20, -inf  ;;  %v2400_v7 = vadd.s32 %v2313_v43, %v2811_v24  ;;  %v2403_v45 = vadd.s32 %v2313_v43, %v1050_v27 }
 0x255   : > { %vm1113_vm8 = vcmp.lt.s32.totalorder %v2363_v14, 300  ;;  %v1298_v6 = vmax.f32 %v1214_v61, %v1297_v4  ;;  %v2407_v31 = vadd.s32 %v2313_v43, %v1039_v28  ;;  %v2410_v37 = vadd.s32 %v2313_v43, %v1040_v48 }
 0x256   : > { %2812 = vst [vmem:[#allocation43_spill] sm:$0xff] %v2393_v10  ;;  %v2413_v10 = vadd.s32 %v2313_v43, %v1041_v63  ;;  %v1218_v20 = vsel %vm1112_vm7, %v2137_v30, -inf  ;;  %v2419_v2 = vadd.s32 240, %v2811_v24  ;;  %v2422_v27 = vadd.s32 %v2313_v43, %v1051_v34 }
 0x257   : > { %vm1114_vm9 = vcmp.lt.s32.totalorder %v2383_v26, 300  ;;  %v1299_v28 = vmax.f32 %v1216_v12, %v1298_v6  ;;  %v2426_v61 = vadd.s32 248, %v2811_v24  ;;  %v2429_v48 = vadd.s32 %v2313_v43, %v1052_v15  ;;  %v2814_v6 = vld [vmem:[#allocation10_spill] sm:$0xff] }
 0x258   : > { %v2432_v63 = vadd.s32 %v2313_v43, %v1053_v19  ;;  %v1220_v30 = vsel %vm1113_vm8, %v2077_v51, -inf  ;;  %v2438_v4 = vadd.s32 %v2313_v43, %v1054_v52  ;;  %vm1103_vm10 = vcmp.lt.s32.totalorder %v2400_v7, 300  ;;  %v2850_v7 = vld [vmem:[#allocation42_spill] sm:$0xff] }
 0x259   : > { %vm1115_vm11 = vcmp.lt.s32.totalorder %v2403_v45, 300  ;;  %v1300_v34 = vmax.f32 %v1218_v20, %v1299_v28  ;;  %vm1104_vm12 = vcmp.lt.s32.totalorder %v2407_v31, 300  ;;  %vm1105_vm13 = vcmp.lt.s32.totalorder %v2410_v37, 300 }
 0x25a   : > { %vm2759_vm14 = vcmp.lt.s32.totalorder %v2413_v10, 300  ;;  %v1222_v24 = vsel %vm1114_vm9, %v2089_v59, -inf  ;;  %v2449_v51 = vadd.s32 %v2313_v43, %v1055_v3  ;;  %v2452_v15 = vadd.s32 %v2313_v43, %v1056_v33  ;;  %v2813_v3 = vld [vmem:[#allocation8_spill] sm:$0xff] }
 0x25b   : > { %vm1116_vm15 = vcmp.lt.s32.totalorder %v2422_v27, 300  ;;  %v1301_v19 = vmax.f32 %v1220_v30, %v1300_v34  ;;  %v2456_v52 = vadd.s32 %v2313_v43, %v1057_v40  ;;  %vm1117_vm0 = vcmp.lt.s32.totalorder %v2429_v48, 300  ;;  %v2815_v40 = vld [vmem:[#allocation12_spill] sm:$0xff]  ;;  %v2816_v27 = vld [vmem:[#allocation18_spill] sm:$0xff]  ;;  %v2818_v48 = vld [vmem:[#allocation15_spill] sm:$0xff] }
 0x25c   : > { %v1199_v12 = vsel %vm1103_vm10, %v2047_v29, -inf  ;;  %v1224_v59 = vsel %vm1115_vm11, %v2104_v5, -inf  ;;  %v1201_v33 = vsel %vm1104_vm12, %v2813_v3, -inf  ;;  %v1203_v20 = vsel %vm1105_vm13, %v2814_v6, -inf }
 0x25d   : > { %v1205_v28 = vsel %vm2759_vm14, %v2815_v40, -inf  ;;  %v1302_v30 = vmax.f32 %v1222_v24, %v1301_v19  ;;  %v2475_v34 = vadd.s32 %v2313_v43, %v1058_v11  ;;  %v2478_v29 = vadd.s32 %v2313_v43, %v1059_v41 }
 0x25e   : > { %v2481_v5 = vadd.s32 %v2313_v43, %v1060_v23  ;;  %v1226_v3 = vsel %vm1116_vm15, %v2116_v13, -inf  ;;  %vm1118_vm1 = vcmp.lt.s32.totalorder %v2432_v63, 300  ;;  %v1207_v6 = vsel %vm1107_vm2, %v2074_v50, -inf }
 0x25f   : > { %v1209_v11 = vsel %vm1108_vm3, %v2086_v58, -inf  ;;  %v1303_v24 = vmax.f32 %v1224_v59, %v1302_v30  ;;  %v2494_v41 = vadd.s32 %v2313_v43, %v1061_v18  ;;  %v1228_v23 = vsel %vm1117_vm0, %v2128_v21, -inf  ;;  %v2817_v30 = vld [vmem:[#allocation14_spill] sm:$0xff] }
 0x260   : > { %v1263_v19 = vmax.f32 %v1199_v12, %v1203_v20  ;;  %v1264_v13 = vmax.f32 %v1201_v33, %v1205_v28  ;;  %vm1119_vm14 = vcmp.lt.s32.totalorder %v2438_v4, 300  ;;  %v1211_v50 = vsel %vm1109_vm4, %v2095_v0, -inf }
 0x261   : > { %v1213_v58 = vsel %vm1110_vm5, %v2107_v8, -inf  ;;  %v1304_v60 = vmax.f32 %v1226_v3, %v1303_v24  ;;  %v2508_v18 = vadd.s32 %v2313_v43, %v2371_v62  ;;  %v1230_v21 = vsel %vm1118_vm1, %v2140_v32, -inf  ;;  %v2819_v3 = vld [vmem:[#allocation43_spill] sm:$0xff] }
 0x262   : > { %v1265_v46 = vmax.f32 %v1263_v19, %v1207_v6  ;;  %v1266_v12 = vmax.f32 %v1264_v13, %v1209_v11  ;;  %vm1120_vm2 = vcmp.lt.s32.totalorder %v2449_v51, 300  ;;  %v1215_v0 = vsel %vm1111_vm6, %v2119_v16, -inf  ;;  %v2820_v6 = vld [vmem:[#allocation20_spill] sm:$0xff]  ;;  %v2822_v13 = vld [vmem:[#allocation17_spill] sm:$0xff] }
 0x263   : > { %v1217_v8 = vsel %vm1112_vm7, %v2131_v25, -inf  ;;  %v1305_v36 = vmax.f32 %v1228_v23, %v1304_v60  ;;  %v2522_v62 = vadd.s32 %v2313_v43, %v2374_v54  ;;  %v1232_v32 = vsel %vm1119_vm14, %v2146_v42, -inf  ;;  %v2821_v19 = vld [vmem:[#allocation16_spill] sm:$0xff]  ;;  %v2823_v60 = vld [vmem:[#allocation22_spill] sm:$0xff] }
 0x264   : > { %v1267_v22 = vmax.f32 %v1265_v46, %v1211_v50  ;;  %v1268_v59 = vmax.f32 %v1266_v12, %v1213_v58  ;;  %vm1121_vm3 = vcmp.lt.s32.totalorder %v2452_v15, 300  ;;  %v1219_v16 = vsel %vm1113_vm8, %v2071_v47, -inf }
 0x265   : > { %v1221_v25 = vsel %vm1114_vm9, %v2083_v55, -inf  ;;  %v1306_v56 = vmax.f32 %v1230_v21, %v1305_v36  ;;  %v2536_v39 = vadd.s32 %v2313_v43, %v2380_v35  ;;  %v1234_v42 = vsel %vm1120_vm2, %v2152_v49, -inf  ;;  %v2825_v36 = vld [vmem:[#allocation21_spill] sm:$0xff] }
 0x266   : > { %v1269_v54 = vmax.f32 %v1267_v22, %v1215_v0  ;;  %v1270_v33 = vmax.f32 %v1268_v59, %v1217_v8  ;;  %vm1122_vm4 = vcmp.lt.s32.totalorder %v2456_v52, 300  ;;  %v1223_v47 = vsel %vm1115_vm11, %v2098_v1, -inf  ;;  %v2824_v0 = vld [vmem:[#allocation19_spill] sm:$0xff] }
 0x267   : > { %v1225_v55 = vsel %vm1116_vm15, %v2110_v9, -inf  ;;  %v1307_v14 = vmax.f32 %v1232_v32, %v1306_v56  ;;  %v2550_v35 = vadd.s32 %v2313_v43, %v2387_v44  ;;  %v1236_v49 = vsel %vm1121_vm3, %v2158_v57, -inf  ;;  %v2826_v32 = vld [vmem:[#allocation24_spill] sm:$0xff]  ;;  %v2828_v56 = vld [vmem:[#allocation25_spill] sm:$0xff] }
 0x268   : > { %v1271_v26 = vmax.f32 %v1269_v54, %v1219_v16  ;;  %v1272_v20 = vmax.f32 %v1270_v33, %v1221_v25  ;;  %vm1123_vm5 = vcmp.lt.s32.totalorder %v2475_v34, 300  ;;  %v1227_v1 = vsel %vm1117_vm0, %v2122_v17, -inf  ;;  %v2827_v25 = vld [vmem:[#allocation23_spill] sm:$0xff] }
 0x269   : > { %v1229_v9 = vsel %vm1118_vm1, %v2134_v38, -inf  ;;  %v1308_v45 = vmax.f32 %v1234_v42, %v1307_v14  ;;  %v2564_v44 = vadd.s32 %v2313_v43, %v2390_v53  ;;  %v1238_v57 = vsel %vm1122_vm4, %v2816_v27, -inf  ;;  %v2831_v14 = vld [vmem:[#allocation29_spill] sm:$0xff] }
 0x26a   : > { %v1273_v40 = vmax.f32 %v1271_v26, %v1223_v47  ;;  %v1274_v28 = vmax.f32 %v1272_v20, %v1225_v55  ;;  %vm1124_vm6 = vcmp.lt.s32.totalorder %v2478_v29, 300  ;;  %v1231_v17 = vsel %vm1119_vm14, %v2817_v30, -inf  ;;  %v2829_v29 = vld [vmem:[#allocation26_spill] sm:$0xff]  ;;  %v2830_v47 = vld [vmem:[#allocation27_spill] sm:$0xff]  ;;  %v2834_v27 = vld [vmem:[#allocation33_spill] sm:$0xff] }
 0x26b   : > { %v1233_v38 = vsel %vm1120_vm2, %v2818_v48, -inf  ;;  %v1309_v63 = vmax.f32 %v1236_v49, %v1308_v45  ;;  %v2578_v53 = vadd.s32 %v2313_v43, %v2819_v3  ;;  %v1240_v11 = vsel %vm1123_vm5, %v2820_v6, -inf  ;;  %v2837_v3 = vld [vmem:[#allocation37_spill] sm:$0xff] }
 0x26c   : > { %v1275_v24 = vmax.f32 %v1273_v40, %v1227_v1  ;;  %v1276_v23 = vmax.f32 %v1274_v28, %v1229_v9  ;;  %vm1125_vm7 = vcmp.lt.s32.totalorder %v2481_v5, 300  ;;  %v1235_v4 = vsel %vm1121_vm3, %v2821_v19, -inf  ;;  %v2832_v5 = vld [vmem:[#allocation28_spill] sm:$0xff]  ;;  %v2833_v9 = vld [vmem:[#allocation31_spill] sm:$0xff]  ;;  %v2835_v40 = vld [vmem:[#allocation30_spill] sm:$0xff] }
 0x26d   : > { %v1237_v51 = vsel %vm1122_vm4, %v2822_v13, -inf  ;;  %v1310_v50 = vmax.f32 %v1238_v57, %v1309_v63  ;;  %v1101_v58 = vadd.s32 %v2313_v43, %v2419_v2  ;;  %v1242_v21 = vsel %vm1124_vm6, %v2823_v60, -inf  ;;  %v2841_v60 = vld [vmem:[#allocation34_spill] sm:$0xff] }
 0x26e   : > { %v1277_v46 = vmax.f32 %v1275_v24, %v1231_v17  ;;  %v1278_v12 = vmax.f32 %v1276_v23, %v1233_v38  ;;  %vm1126_vm8 = vcmp.lt.s32.totalorder %v2494_v41, 300  ;;  %v1239_v15 = vsel %vm1123_vm5, %v2824_v0, -inf  ;;  %v2836_v38 = vld [vmem:[#allocation35_spill] sm:$0xff] }
 0x26f   : > { %v1311_v8 = vmax.f32 %v1240_v11, %v1310_v50  ;;  %v1241_v52 = vsel %vm1124_vm6, %v2825_v36, -inf  ;;  %v1102_v2 = vadd.s32 %v2313_v43, %v2426_v61  ;;  %v1244_v22 = vsel %vm1125_vm7, %v2826_v32, -inf  ;;  %v2838_v11 = vld [vmem:[#allocation32_spill] sm:$0xff] }
 0x270   : > { %v1279_v59 = vmax.f32 %v1277_v46, %v1235_v4  ;;  %v1280_v16 = vmax.f32 %v1278_v12, %v1237_v51  ;;  %vm1127_vm9 = vcmp.lt.s32.totalorder %v2508_v18, 300  ;;  %v1243_v34 = vsel %vm1125_vm7, %v2827_v25, -inf  ;;  %v2839_v4 = vld [vmem:[#allocation39_spill] sm:$0xff]  ;;  %v2840_v51 = vld [vmem:[#allocation41_spill] sm:$0xff]  ;;  %v1325_v32 = vld [vmem:[%s1890_s27] sm:$0xff] }
 0x271   : > { %v1312_v41 = vmax.f32 %v1242_v21, %v1311_v8  ;;  %v1245_v42 = vsel %vm1126_vm8, %v2828_v56, -inf  ;;  %vm1128_vm11 = vcmp.lt.s32.totalorder %v2522_v62, 300  ;;  %v1246_v54 = vsel %vm1126_vm8, %v2829_v29, -inf  ;;  %v2846_v56 = vld [vmem:[#allocation40_spill] sm:$0xff] }
 0x272   : > { %v1281_v43 = vmax.f32 %v1279_v59, %v1239_v15  ;;  %v1282_v61 = vmax.f32 %v1280_v16, %v1241_v52  ;;  %vm1129_vm14 = vcmp.lt.s32.totalorder %v2536_v39, 300  ;;  %v1247_v55 = vsel %vm1127_vm9, %v2830_v47, -inf  ;;  %v2842_v15 = vld [vmem:[#allocation36_spill] sm:$0xff] }
 0x273   : > { %v1313_v33 = vmax.f32 %v1244_v22, %v1312_v41  ;;  %v1249_v18 = vsel %vm1128_vm11, %v2831_v14, -inf  ;;  %vm1130_vm15 = vcmp.lt.s32.totalorder %v2550_v35, 300  ;;  %v1248_v49 = vsel %vm1127_vm9, %v2832_v5, -inf  ;;  %v2843_v22 = vld [vmem:[#allocation38_spill] sm:$0xff]  ;;  %v2844_v41 = vld [vmem:[#allocation7_spill] sm:$0xff] }
 0x274   : > { %v1283_v26 = vmax.f32 %v1281_v43, %v1243_v34  ;;  %v1284_v20 = vmax.f32 %v1282_v61, %v1245_v42  ;;  %vm1131_vm0 = vcmp.lt.s32.totalorder %v2564_v44, 300  ;;  %v1251_v45 = vsel %vm1129_vm14, %v2833_v9, -inf  ;;  %v2845_v34 = vld [vmem:[#allocation11_spill] sm:$0xff]  ;;  %v2847_v43 = vld [vmem:[#allocation9_spill] sm:$0xff] }
 0x275   : > { %v1314_v1 = vmax.f32 %v1246_v54, %v1313_v33  ;;  %v1253_v57 = vsel %vm1130_vm15, %v2834_v27, -inf  ;;  %vm1132_vm1 = vcmp.lt.s32.totalorder %v2578_v53, 300  ;;  %v1250_v28 = vsel %vm1128_vm11, %v2835_v40, -inf  ;;  %v2848_v61 = vld [vmem:[#allocation13_spill] sm:$0xff] }
 0x276   : > { %v1285_v30 = vmax.f32 %v1283_v26, %v1247_v55  ;;  %v1286_v17 = vmax.f32 %v1284_v20, %v1249_v18  ;;  %vm1133_vm2 = vcmp.lt.s32.totalorder %v1101_v58, 300  ;;  %v1255_v63 = vsel %vm1131_vm0, %v2836_v38, -inf  ;;  %v1326_v5 = vld [vmem:[%s1890_s27 + $0x8] sm:$0xff] }
 0x277   : > { %v1315_v48 = vmax.f32 %v1248_v49, %v1314_v1  ;;  %v1257_v6 = vsel %vm1132_vm1, %v2837_v3, -inf  ;;  %vm1134_vm3 = vcmp.lt.s32.totalorder %v1102_v2, 300  ;;  %v1252_v24 = vsel %vm1129_vm14, %v2838_v11, -inf }
 0x278   : > { %v1287_v62 = vmax.f32 %v1285_v30, %v1251_v45  ;;  %v1288_v23 = vmax.f32 %v1286_v17, %v1253_v57  ;;  %v1259_v13 = vsel %vm1133_vm2, %v2839_v4, -inf  ;;  %v1261_v50 = vsel %vm1134_vm3, %v2840_v51, -inf }
 0x279   : > { %v1316_v19 = vmax.f32 %v1250_v28, %v1315_v48  ;;  %v1254_v21 = vsel %vm1130_vm15, %v2841_v60, -inf  ;;  %v1256_v39 = vsel %vm1131_vm0, %v2842_v15, -inf  ;;  %v1258_v59 = vsel %vm1132_vm1, %v2843_v22, -inf }
 0x27a   : > { %v1289_v46 = vmax.f32 %v1287_v62, %v1255_v63  ;;  %v1290_v12 = vmax.f32 %v1288_v23, %v1257_v6  ;;  %v1200_v25 = vsel %vm1103_vm10, %v2844_v41, -inf  ;;  %v1204_v44 = vsel %vm1105_vm13, %v2845_v34, -inf }
 0x27b   : > { %v1317_v0 = vmax.f32 %v1252_v24, %v1316_v19  ;;  %v1260_v42 = vsel %vm1133_vm2, %v2846_v56, -inf  ;;  %v1202_v53 = vsel %vm1104_vm12, %v2847_v43, -inf  ;;  %vm2849_vm4 = vcmp.lt.s32.totalorder %v2413_v10, 300 }
 0x27c   : > { %v1291_v8 = vmax.f32 %v1289_v46, %v1259_v13  ;;  %v1292_v36 = vmax.f32 %v1290_v12, %v1261_v50  ;;  %v1206_v33 = vsel %vm2849_vm4, %v2848_v61, -inf  ;;  %v1262_v47 = vsel %vm1134_vm3, %v2850_v7, -inf }
 0x27d   : > { %v1318_v52 = vmax.f32 %v1254_v21, %v1317_v0  ;;  %v1294_v55 = vmax.f32 %v1200_v25, %v1204_v44  ;;  %v1295_v58 = vmax.f32 %v1202_v53, %v1206_v33 }
 0x27e   : > { %v1293_v16 = vmax.f32 %v1291_v8, %v1292_v36 }
 0x27f   : > { %v1319_v35 = vmax.f32 %v1256_v39, %v1318_v52 }
 0x280   : > { %v1327_v29 = vmax.f32 %v1325_v32, %v1293_v16 }
 0x281   : > { %v1320_v54 = vmax.f32 %v1258_v59, %v1319_v35 }
 0x282   : > { %1329 = vst [vmem:[%s1890_s27] sm:$0xff] %v1327_v29 }
 0x283   : > { %v1321_v37 = vmax.f32 %v1260_v42, %v1320_v54 }
 0x285   : > { %v1322_v14 = vmax.f32 %v1262_v47, %v1321_v37 }
 0x287   : > { %v1323_v18 = vmax.f32 %v1294_v55, %v1322_v14 }
 0x289   : > { %v1324_v49 = vmax.f32 %v1295_v58, %v1323_v18 }
 0x28b   : > { %v1328_v26 = vmax.f32 %v1326_v5, %v1324_v49 }
 0x28d   : > { %1330 = vst [vmem:[%s1890_s27 + $0x8] sm:$0xff] %v1328_v26 }
 0x28e PF: > { %s1493_s15 = sshll.u32 %s1757_s21, 1  ;;  %s1494_s30 = sshll.u32 %s1761_s22, 2 }
 0x28f   : > { %s1348_s8 = sshll.u32 %s1890_s27, 4  ;;  %s1344_s13 = sadd.s32 %s1494_s30, %s1493_s15  ;;  %s1349_s8 = int_to_ptr.vmem [resolvable:$true] %s1348_s8 }
 0x290   : > { %s1495_s14 = sshll.u32 %s1344_s13, 7  ;;  %s2851_s9 = sand.u32 1, %s1749_s19  }
 0x291   : > { %s1346_s26 = scalar_lea.hbm %s2727_s5, %s1495_s14  ;;  %s1332_s10 = scalar_lea.sflag [#allocation3], %s2851_s9 }
 0x292   : > { %s1681_s1 = scalar_lea.vmem %s1349_s8, 256  ;;  %s1777_s29 = smov [#allocation2]  }
 0x293   : > { %p1682_p2 = scmp.ne.s32.totalorder %s1349_s8, %s1681_s1  ;;  %s1685_s12 = sshll.u32 %s1777_s29, 4  ;;  %s1686_s12 = int_to_ptr.vmem [resolvable:$false] %s1685_s12 }
 0x294   : > { %s1687_s21 = scalar_lea.vmem %s1686_s12, 512  ;;  %p1688_p6 = scmp.lt.s32.totalorder %s1349_s8, %s1686_s12 }
 0x295   : > { %p1683_p4 = pnand %p1682_p2, %p1859_p3  ;;  %p1689_p7 = scmp.lt.s32.totalorder %s1687_s21, %s1681_s1 }
 0x297   : > { %p1684_p5 = pneg %p1683_p4  ;;  %p1690_p9 = por %p1689_p7, %p1688_p6 }
 0x299   : > { %p1691_p10 = pnand %p1690_p9, %p1684_p5 }
 0x29b   : > { %1694 = shalt.err (!%p1691_p10)
}
 0x29c   : > { %s1695_s22 = scalar_lea.hbm %s1346_s26, 256  ;;  %s1699_s30 = scalar_lea.hbm %s2727_s5, 1024 }
 0x29d   : > { %p1696_p11 = scmp.ne.s32.totalorder %s1346_s26, %s1695_s22  ;;  %p1700_p0 = scmp.lt.s32.totalorder %s1346_s26, %s2727_s5 }
 0x29e   : > { %p1701_p1 = scmp.lt.s32.totalorder %s1699_s30, %s1695_s22 }
 0x29f   : > { %p1697_p12 = pnand %p1696_p11, %p1859_p3 }
 0x2a0   : > { %p1702_p2 = por %p1701_p1, %p1700_p0 }
 0x2a1   : > { %p1698_p13 = pneg %p1697_p12 }
 0x2a3   : > { %p1703_p4 = pnand %p1702_p2, %p1698_p13 }
 0x2a5   : > { %1706 = shalt.err (!%p1703_p4)
}
 0x2a6   : > { %1568 = dma.vmem_to_hbm [thread:$0]  (%p1859_p3), %s1349_s8, 256, %s1346_s26, %s1332_s10  }
 0x2a7 PF: > { %p1574_p5 = scmp.ge.s32.totalorder %s1773_s25, 2  ;;  %s1360_s16 = sand.u32 1, %s1745_s18  }
 0x2a8   : > { %s1361_s17 = scalar_lea.sflag [#allocation3], %s1360_s16 }
 0x2a9   : > { %p1571_p6 = pnand %p1574_p5, %p1868_p8 }
 0x2ab   : > { %p1572_p7 = pneg %p1571_p6 }
 0x2ad   : > { %1740 = dma.done.wait (%p1572_p7), %s1361_s17, 256  }
 0x2ae   : > { %1742 = vsyncadd (%p1572_p7), %s1361_s17, 4294967040  ;;  %s18_s25 = sadd.s32 1, %s1773_s25   ;;  %s2852_s6 = sld [smem:[#allocation5_spill]] }
 0x2af   : > { %p15_p9 = scmp.ge.s32.totalorder %s18_s25, 6   ;;  %s2853_s18 = smov %s1749_s19 }
 0x2b0   : > { %s2854_s19 = smov %s1753_s20  ;;  %s2855_s20 = smov %s1877_s11 }
 0x2b1   : > { %s2856_s21 = smov %s1765_s23  ;;  %s2857_s22 = smov %s1769_s24 }
 0x2b2   : > { %s2858_s23 = smov %s2861_s28  ;;  %17 = sbr.rel (!%p15_p9) target bundleno = 7 (0x7), region = 87 }
 0x2b4   : > { %s2859_s24 = smov %s2852_s6 }
 0x2b7   :  { %1366 = vsyncpa [#allocation3], 1 }
 0x2b8   :  { %1368 = vsyncpa [#allocation3 + $0x1], 1 }

</bundles_post_ra>
